<compile_context>
chip_gen: v7x
topology: tpu7x:2x2x1
jax: 0.10.0
libtpu: 0.0.40
codegen_flags: <defaults>
</compile_context>

<pallas_src>
import jax
import jax.numpy as jnp
import numpy as np
from jax import lax
from jax.experimental import pallas as pl
from jax.experimental.pallas import tpu as pltpu

# ---- scaled-down but structurally identical sizes -------------------------------------
B = 2              # batch
T = 16             # audio frames (wav2vec2 output length)
L = 8              # text / label sequence length
E = 16             # label embedding dim        (512 in the original)
RNN_H = 16         # LSTM hidden size           (512 in the original)
H = 2 * RNN_H      # bi-LSTM output dim == wav2vec2 hidden dim (1024 in the original)
LID_E = 3          # LID embedding dim
NUM_LABELS = 32    # config.num_labels
VOCAB = 83         # label-embedding vocab size
FEAT = 20          # raw features per audio frame for the stand-in encoder

BP = ((B + 7) // 8) * 8                      # batch padded to a sublane multiple (LSTM kernel)
NPAD = ((NUM_LABELS + 127) // 128) * 128     # lane-dense logits width


# ======================= kernel 1: bidirectional LSTM ==================================
def _bilstm_kernel(x_ref, wih_ref, whh_ref, b_ref, out_ref, xproj_ref):
    """One grid step per LSTM direction (d=0 forward, d=1 backward).

    x_ref    : (L*BP, E)      time-major input, shared by both directions
    wih_ref  : (1, E, 4h)     input->hidden weights (transposed), this direction
    whh_ref  : (1, h, 4h)     hidden->hidden weights (transposed)
    b_ref    : (1, 1, 4h)     merged bias b_ih + b_hh
    out_ref  : (1, L, BP, h)  per-direction hidden states
    xproj_ref: (L*BP, 4h)     VMEM scratch: hoisted input projection
    """
    seq_len = out_ref.shape[1]
    batch = out_ref.shape[2]
    h = out_ref.shape[3]
    d = pl.program_id(0)
    reverse = d == 1

    # Hoisted input projection + bias: ONE (L*BP, E) @ (E, 4h) matmul instead of one
    # tiny M=B matmul per recurrence step.
    xproj_ref[...] = (
        jnp.dot(x_ref[...], wih_ref[0], preferred_element_type=jnp.float32)
        + b_ref[0])

    whh = whh_ref[0]

    def step(i, carry):
        h_prev, c_prev = carry
        t = jnp.where(reverse, seq_len - 1 - i, i)
        row = pl.multiple_of(t * batch, 8)          # BP is a multiple of 8 -> aligned slice
        g = (xproj_ref[pl.ds(row, batch), :]
             + jnp.dot(h_prev, whh, preferred_element_type=jnp.float32))
        # PyTorch gate order [i, f, g, o].  (At production h=512 these lane slices are
        # 128-aligned; at the scaled h=16 they lower to cheap masked selects.)
        i_g = jax.nn.sigmoid(g[:, 0:h])
        f_g = jax.nn.sigmoid(g[:, h:2 * h])
        g_g = jnp.tanh(g[:, 2 * h:3 * h])
        o_g = jax.nn.sigmoid(g[:, 3 * h:4 * h])
        c_new = f_g * c_prev + i_g * g_g
        h_new = o_g * jnp.tanh(c_new)
        out_ref[0, t] = h_new
        return h_new, c_new

    zeros = jnp.zeros((batch, h), jnp.float32)
    lax.fori_loop(0, seq_len, step, (zeros, zeros), unroll=True)


def bilstm(x2, wih_s, whh_s, b_s, seq_len, batch_p):
    """x2: (L*BP, E) time-major input.  Returns (2, L, BP, h): [forward, backward]."""
    h = whh_s.shape[1]
    return pl.pallas_call(
        _bilstm_kernel,
        out_shape=jax.ShapeDtypeStruct((2, seq_len, batch_p, h), jnp.float32),
        grid=(2,),
        in_specs=[
            pl.BlockSpec(x2.shape, lambda d: (0, 0)),
            pl.BlockSpec((1,) + wih_s.shape[1:], lambda d: (d, 0, 0)),
            pl.BlockSpec((1,) + whh_s.shape[1:], lambda d: (d, 0, 0)),
            pl.BlockSpec((1,) + b_s.shape[1:], lambda d: (d, 0, 0)),
        ],
        out_specs=pl.BlockSpec((1, seq_len, batch_p, h), lambda d: (d, 0, 0, 0)),
        scratch_shapes=[pltpu.VMEM((seq_len * batch_p, 4 * h), jnp.float32)],
        # The two directions are independent -> run on separate TensorCores on v7x.
        compiler_params=pltpu.CompilerParams(dimension_semantics=("parallel",)),
    )(x2, wih_s, whh_s, b_s)


# ============ kernel 2: joint attention + fused lm_head (LID folded into bias) =========
def _attn_head_kernel(hidden_ref, labels_ref, wscore_t_ref,
                      wh_t_ref, wc_t_ref, bias_ref, out_ref):
    hs = hidden_ref[0]      # (T, H)
    lp = labels_ref[0]      # (L, H)

    # key = score(labels_pr)           (L, H)
    key = jnp.dot(lp, wscore_t_ref[...], preferred_element_type=jnp.float32)

    # attn_score = hidden @ key^T      (T, L)
    s = lax.dot_general(hs, key, (((1,), (1,)), ((), ())),
                        preferred_element_type=jnp.float32)

    m = jnp.max(s, axis=-1, keepdims=True)
    e = jnp.exp(s - m)
    den = jnp.sum(e, axis=-1, keepdims=True)
    inv = pl.reciprocal(den + 1e-30, approx=False)      # EUP reciprocal-multiply
    w = e * inv                                          # (T, L)

    # Context path refactor: (w @ lp) @ Wc^T  ==  w @ (lp @ Wc^T); the latter never
    # materializes a (T, H) context and cuts MXU FLOPs at real sizes (N << H).
    lp_c = jnp.dot(lp, wc_t_ref[...], preferred_element_type=jnp.float32)   # (L, NPAD)

    out = (jnp.dot(hs, wh_t_ref[...], preferred_element_type=jnp.float32)
           + jnp.dot(w, lp_c, preferred_element_type=jnp.float32)
           + bias_ref[0])                                                   # (T, NPAD)
    out_ref[0] = out


def attn_lm_head(hidden, labels_pr, wscore_t, wh_t_p, wc_t_p, bias_p):
    # TODO(synk): at real wav2vec2 lengths (T in the hundreds+, H=1024) tile the T axis
    #             (grid=(B, T//tT), labels/key kept resident via @pl.when(t==0)), size the
    #             tile per generation (v7x: 64 MiB VMEM) and raise vmem_limit_bytes; cast
    #             the big matmul operands to bf16 on v6e/v7x with a loosened tolerance.
    batch, t, h = hidden.shape
    _, l, _ = labels_pr.shape
    npad = wh_t_p.shape[1]
    return pl.pallas_call(
        _attn_head_kernel,
        out_shape=jax.ShapeDtypeStruct((batch, t, npad), jnp.float32),
        grid=(batch,),
        in_specs=[
            pl.BlockSpec((1, t, h), lambda b: (b, 0, 0)),
            pl.BlockSpec((1, l, h), lambda b: (b, 0, 0)),
            pl.BlockSpec(wscore_t.shape, lambda b: (0, 0)),
            pl.BlockSpec(wh_t_p.shape, lambda b: (0, 0)),
            pl.BlockSpec(wc_t_p.shape, lambda b: (0, 0)),
            pl.BlockSpec((1, 1, npad), lambda b: (b, 0, 0)),
        ],
        out_specs=pl.BlockSpec((1, t, npad), lambda b: (b, 0, 0)),
        compiler_params=pltpu.CompilerParams(dimension_semantics=("parallel",)),
    )(hidden, labels_pr, wscore_t, wh_t_p, wc_t_p, bias_p)


# ============================== parameter setup =========================================
def init_params(key):
    ks = jax.random.split(key, 16)
    p = {}
    p["w_enc"] = 0.1 * jax.random.normal(ks[0], (FEAT, H), jnp.float32)        # stand-in encoder
    p["embeds"] = 0.5 * jax.random.normal(ks[1], (VOCAB, E), jnp.float32)      # nn.Embedding(83, 512)
    p["embeds_text"] = 0.5 * jax.random.normal(ks[2], (3, LID_E), jnp.float32)  # nn.Embedding(3, 3)
    # nn.LSTM(E, RNN_H, bidirectional=True): gate order [i, f, g, o]
    s = 1.0 / np.sqrt(RNN_H)
    p["wih_f"] = s * jax.random.normal(ks[3], (4 * RNN_H, E), jnp.float32)
    p["whh_f"] = s * jax.random.normal(ks[4], (4 * RNN_H, RNN_H), jnp.float32)
    p["b_f"] = s * jax.random.normal(ks[5], (4 * RNN_H,), jnp.float32)          # b_ih + b_hh merged
    p["wih_b"] = s * jax.random.normal(ks[6], (4 * RNN_H, E), jnp.float32)
    p["whh_b"] = s * jax.random.normal(ks[7], (4 * RNN_H, RNN_H), jnp.float32)
    p["b_b"] = s * jax.random.normal(ks[8], (4 * RNN_H,), jnp.float32)
    p["w_score"] = 0.1 * jax.random.normal(ks[9], (H, H), jnp.float32)          # Linear(H, H, bias=False)
    p["w_lm"] = 0.1 * jax.random.normal(ks[10], (NUM_LABELS, 2 * H + LID_E), jnp.float32)
    p["b_lm"] = 0.1 * jax.random.normal(ks[11], (NUM_LABELS,), jnp.float32)
    # NOTE: self.fc is defined in __init__ but unused in forward -> not materialized here.
    return p


# ============================== full forward (wrapper) ==================================
@jax.jit
def ssl_joint_forward(speech, labels_ref, labels_lid, params):
    # --- wav2vec2 stand-in (glue)  # TODO(synk): real Wav2Vec2ForCTC encoder not implemented
    frames = speech.reshape(B, T, FEAT)
    hidden_states = jnp.tanh(frames @ params["w_enc"])                 # (B, T, H)

    # --- labels_pr[labels_pr < 0] = 82 ; embedding lookup (glue)
    labels_fixed = jnp.where(labels_ref < 0, 82, labels_ref)
    lbl_emb = jnp.take(params["embeds"], labels_fixed, axis=0)         # (B, L, E)

    # time-major layout, batch padded to a sublane multiple for the LSTM kernel
    x_lbe = jnp.transpose(lbl_emb, (1, 0, 2))                          # (L, B, E)
    x_pad = jnp.pad(x_lbe, ((0, 0), (0, BP - B), (0, 0)))              # (L, BP, E)
    x2 = x_pad.reshape(L * BP, E)

    wih_s = jnp.stack([params["wih_f"].T, params["wih_b"].T])          # (2, E, 4h)
    whh_s = jnp.stack([params["whh_f"].T, params["whh_b"].T])          # (2, h, 4h)
    b_s = jnp.stack([params["b_f"].reshape(1, -1),
                     params["b_b"].reshape(1, -1)])                    # (2, 1, 4h)

    lstm_out = bilstm(x2, wih_s, whh_s, b_s, L, BP)                    # (2, L, BP, h)
    lstm_out = lstm_out[:, :, :B, :]                                   # drop batch padding
    labels_pr = jnp.transpose(lstm_out, (2, 1, 0, 3)).reshape(B, L, H)  # (B, L, 2h) = [fwd|bwd]

    # --- fold LID embedding into a per-batch lm_head bias (host-side, tiny)
    lid_emb = jnp.take(params["embeds_text"], labels_lid, axis=0)      # (B, 3)
    w_lm = params["w_lm"]
    wh_t = w_lm[:, :H].T                                               # (H, N)
    wc_t = w_lm[:, H:2 * H].T                                          # (H, N)
    wlid_t = w_lm[:, 2 * H:].T                                         # (3, N)
    bias_b = params["b_lm"][None, :] + lid_emb @ wlid_t                # (B, N)

    # --- pad lm_head outputs to a lane-dense width (128) so stores are unmasked
    pad = NPAD - NUM_LABELS
    wh_t_p = jnp.pad(wh_t, ((0, 0), (0, pad)))
    wc_t_p = jnp.pad(wc_t, ((0, 0), (0, pad)))
    bias_p = jnp.pad(bias_b, ((0, 0), (0, pad))).reshape(B, 1, NPAD)

    logits_pad = attn_lm_head(hidden_states, labels_pr, params["w_score"].T,
                              wh_t_p, wc_t_p, bias_p)                  # (B, T, NPAD)
    logits_pr = logits_pad[:, :, :NUM_LABELS]
    return {"PR": logits_pr}, hidden_states


# ============================== pure-JAX reference ======================================
def _ref_lstm_dir(x_lbe, wih_t, whh_t, b, reverse):
    h = whh_t.shape[0]

    def step(carry, xt):
        hp, cp = carry
        g = xt @ wih_t + hp @ whh_t + b
        i = jax.nn.sigmoid(g[:, :h])
        f = jax.nn.sigmoid(g[:, h:2 * h])
        gg = jnp.tanh(g[:, 2 * h:3 * h])
        o = jax.nn.sigmoid(g[:, 3 * h:4 * h])
        cn = f * cp + i * gg
        hn = o * jnp.tanh(cn)
        return (hn, cn), hn

    init = (jnp.zeros((x_lbe.shape[1], h)), jnp.zeros((x_lbe.shape[1], h)))
    _, outs = lax.scan(step, init, x_lbe, reverse=reverse)
    return outs


def reference_forward(speech, labels_ref, labels_lid, params):
    frames = speech.reshape(B, T, FEAT)
    hidden = jnp.tanh(frames @ params["w_enc"])
    labels_fixed = jnp.where(labels_ref < 0, 82, labels_ref)
    lbl_emb = jnp.take(params["embeds"], labels_fixed, axis=0)
    x_lbe = jnp.transpose(lbl_emb, (1, 0, 2))
    of = _ref_lstm_dir(x_lbe, params["wih_f"].T, params["whh_f"].T, params["b_f"], False)
    ob = _ref_lstm_dir(x_lbe, params["wih_b"].T, params["whh_b"].T, params["b_b"], True)
    labels_pr = jnp.transpose(jnp.concatenate([of, ob], axis=-1), (1, 0, 2))
    key = labels_pr @ params["w_score"].T
    s = jnp.einsum("bth,blh->btl", hidden, key)
    m = jnp.max(s, axis=-1, keepdims=True)
    e = jnp.exp(s - m)
    w = e / (jnp.sum(e, axis=-1, keepdims=True) + 1e-30)
    c = jnp.einsum("btl,blh->bth", w, labels_pr)
    lid_emb = jnp.take(params["embeds_text"], labels_lid, axis=0)       # (B, 3)
    fused = jnp.concatenate(
        [hidden, c, jnp.broadcast_to(lid_emb[:, None, :], (B, T, LID_E))], axis=-1)
    out = fused @ params["w_lm"].T + params["b_lm"]
    return out, hidden


# ======================================= main ===========================================
if __name__ == "__main__":
    root = jax.random.PRNGKey(0)
    k_par, k_speech, k_lbl, k_lid = jax.random.split(root, 4)
    params = init_params(k_par)

    speech = jax.random.normal(k_speech, (B, T * FEAT), jnp.float32)
    labels_ref = jax.random.randint(k_lbl, (B, L), -2, VOCAB, dtype=jnp.int32)   # includes negatives
    labels_lid = jax.random.randint(k_lid, (B,), 0, 3, dtype=jnp.int32)

    logits, hidden_states = ssl_joint_forward(speech, labels_ref, labels_lid, params)
    out = jax.block_until_ready(logits["PR"])

    ref_out, _ = reference_forward(speech, labels_ref, labels_lid, params)
    np.testing.assert_allclose(np.asarray(out), np.asarray(ref_out), rtol=2e-5, atol=2e-5)

    assert out.shape == (B, T, NUM_LABELS)
    print("KERNEL_OK")
</pallas_src>

<mosaic_0001>
module attributes {stable_mosaic.version = 11 : i64} {
  func.func @_bilstm_kernel(%arg0: i32, %arg1: memref<64x16xf32, #tpu.memory_space<vmem>>, %arg2: memref<1x16x64xf32, #tpu.memory_space<vmem>>, %arg3: memref<1x16x64xf32, #tpu.memory_space<vmem>>, %arg4: memref<1x1x64xf32, #tpu.memory_space<vmem>>, %arg5: memref<1x8x8x16xf32, #tpu.memory_space<vmem>>, %arg6: memref<64x64xf32, #tpu.memory_space<vmem>>) attributes {dimension_semantics = [#tpu.dimension_semantics<parallel>], iteration_bounds = array<i64: 2>, scalar_prefetch = 0 : i64, scratch_operands = 1 : i64, tpu.core_type = #tpu.core_type<tc>, window_params = [{pipeline_mode = #tpu.pipeline_mode<synchronous>, transform_indices = @transform_0, window_bounds = array<i64: 64, 16>}, {transform_indices = @transform_1, window_bounds = array<i64: 1, 16, 64>}, {transform_indices = @transform_2, window_bounds = array<i64: 1, 16, 64>}, {transform_indices = @transform_3, window_bounds = array<i64: 1, 1, 64>}, {transform_indices = @transform_4, window_bounds = array<i64: 1, 8, 8, 16>}]} {
    %c1_i32 = arith.constant 1 : i32
    %0 = arith.cmpi eq, %arg0, %c1_i32 : i32
    %c0 = arith.constant 0 : index
    %c0_0 = arith.constant 0 : index
    %1 = vector.load %arg1[%c0, %c0_0] : memref<64x16xf32, #tpu.memory_space<vmem>>, vector<64x16xf32>
    %c0_1 = arith.constant 0 : index
    %c0_2 = arith.constant 0 : index
    %c0_3 = arith.constant 0 : index
    %2 = vector.load %arg2[%c0_1, %c0_2, %c0_3] : memref<1x16x64xf32, #tpu.memory_space<vmem>>, vector<1x16x64xf32>
    %3 = vector.shape_cast %2 : vector<1x16x64xf32> to vector<16x64xf32>
    %cst = arith.constant dense<0.000000e+00> : vector<64x64xf32>
    %4 = tpu.matmul %1, %3, %cst {dimension_numbers = #tpu.dot_dimension_numbers<[1], [0], [0], [1], [0, 0, 1, 1], [], []>} : vector<64x16xf32>, vector<16x64xf32>, vector<64x64xf32> -> vector<64x64xf32>
    %c0_4 = arith.constant 0 : index
    %c0_5 = arith.constant 0 : index
    %c0_6 = arith.constant 0 : index
    %5 = vector.load %arg4[%c0_4, %c0_5, %c0_6] : memref<1x1x64xf32, #tpu.memory_space<vmem>>, vector<1x1x64xf32>
    %6 = vector.shape_cast %5 : vector<1x1x64xf32> to vector<1x64xf32>
    %7 = vector.broadcast %6 : vector<1x64xf32> to vector<64x64xf32>
    %8 = arith.addf %4, %7 : vector<64x64xf32>
    %c0_7 = arith.constant 0 : index
    %c0_8 = arith.constant 0 : index
    %9 = vector.load %arg6[%c0_7, %c0_8] : memref<64x64xf32, #tpu.memory_space<vmem>>, vector<64x64xf32>
    tpu.vector_store %arg6[%c0_7, %c0_8], %8 {strides = array<i32>} : memref<64x64xf32, #tpu.memory_space<vmem>>, vector<64x64xf32>,
    %c0_9 = arith.constant 0 : index
    %c0_10 = arith.constant 0 : index
    %c0_11 = arith.constant 0 : index
    %10 = vector.load %arg3[%c0_9, %c0_10, %c0_11] : memref<1x16x64xf32, #tpu.memory_space<vmem>>, vector<1x16x64xf32>
    %11 = vector.shape_cast %10 : vector<1x16x64xf32> to vector<16x64xf32>
    %cst_12 = arith.constant 0.000000e+00 : f32
    %12 = vector.broadcast %cst_12 : f32 to vector<8x16xf32>
    %c0_i32 = arith.constant 0 : i32
    %c7_i32 = arith.constant 7 : i32
    %13 = arith.subi %c7_i32, %c0_i32 : i32
    %14 = arith.select %0, %13, %c0_i32 : i32
    %c8_i32 = arith.constant 8 : i32
    %15 = arith.muli %14, %c8_i32 : i32
    %16 = tpu.assume_multiple %15, 8 : i32
    %17 = arith.index_cast %16 : i32 to index
    %c0_13 = arith.constant 0 : index
    %18 = vector.load %arg6[%17, %c0_13] : memref<64x64xf32, #tpu.memory_space<vmem>>, vector<8x64xf32>
    %cst_14 = arith.constant dense<0.000000e+00> : vector<8x64xf32>
    %19 = tpu.matmul %12, %11, %cst_14 {dimension_numbers = #tpu.dot_dimension_numbers<[1], [0], [0], [1], [0, 0, 1, 1], [], []>} : vector<8x16xf32>, vector<16x64xf32>, vector<8x64xf32> -> vector<8x64xf32>
    %20 = arith.addf %18, %19 : vector<8x64xf32>
    %21 = vector.extract_strided_slice %20 {offsets = [0, 0], sizes = [8, 16], strides = [1, 1]} : vector<8x64xf32> to vector<8x16xf32>
    %22 = arith.negf %21 : vector<8x16xf32>
    %23 = math.exp %22 : vector<8x16xf32>
    %cst_15 = arith.constant 1.000000e+00 : f32
    %24 = vector.broadcast %cst_15 : f32 to vector<8x16xf32>
    %25 = arith.addf %24, %23 : vector<8x16xf32>
    %26 = arith.divf %24, %25 : vector<8x16xf32>
    %27 = vector.extract_strided_slice %20 {offsets = [0, 16], sizes = [8, 16], strides = [1, 1]} : vector<8x64xf32> to vector<8x16xf32>
    %28 = arith.negf %27 : vector<8x16xf32>
    %29 = math.exp %28 : vector<8x16xf32>
    %cst_16 = arith.constant 1.000000e+00 : f32
    %30 = vector.broadcast %cst_16 : f32 to vector<8x16xf32>
    %31 = arith.addf %30, %29 : vector<8x16xf32>
    %32 = arith.divf %30, %31 : vector<8x16xf32>
    %33 = vector.extract_strided_slice %20 {offsets = [0, 32], sizes = [8, 16], strides = [1, 1]} : vector<8x64xf32> to vector<8x16xf32>
    %34 = math.tanh %33 : vector<8x16xf32>
    %35 = vector.extract_strided_slice %20 {offsets = [0, 48], sizes = [8, 16], strides = [1, 1]} : vector<8x64xf32> to vector<8x16xf32>
    %36 = arith.negf %35 : vector<8x16xf32>
    %37 = math.exp %36 : vector<8x16xf32>
    %cst_17 = arith.constant 1.000000e+00 : f32
    %38 = vector.broadcast %cst_17 : f32 to vector<8x16xf32>
    %39 = arith.addf %38, %37 : vector<8x16xf32>
    %40 = arith.divf %38, %39 : vector<8x16xf32>
    %41 = arith.mulf %32, %12 : vector<8x16xf32>
    %42 = arith.mulf %26, %34 : vector<8x16xf32>
    %43 = arith.addf %41, %42 : vector<8x16xf32>
    %44 = math.tanh %43 : vector<8x16xf32>
    %45 = arith.mulf %40, %44 : vector<8x16xf32>
    %c0_18 = arith.constant 0 : index
    %46 = arith.index_cast %14 : i32 to index
    %c0_19 = arith.constant 0 : index
    %c0_20 = arith.constant 0 : index
    %47 = vector.load %arg5[%c0_18, %46, %c0_19, %c0_20] : memref<1x8x8x16xf32, #tpu.memory_space<vmem>>, vector<1x1x8x16xf32>
    %48 = vector.shape_cast %47 : vector<1x1x8x16xf32> to vector<8x16xf32>
    %49 = vector.shape_cast %45 : vector<8x16xf32> to vector<1x1x8x16xf32>
    tpu.vector_store %arg5[%c0_18, %46, %c0_19, %c0_20], %49 {strides = array<i32>} : memref<1x8x8x16xf32, #tpu.memory_space<vmem>>, vector<1x1x8x16xf32>,
    %c1_i32_21 = arith.constant 1 : i32
    %c7_i32_22 = arith.constant 7 : i32
    %50 = arith.subi %c7_i32_22, %c1_i32_21 : i32
    %51 = arith.select %0, %50, %c1_i32_21 : i32
    %c8_i32_23 = arith.constant 8 : i32
    %52 = arith.muli %51, %c8_i32_23 : i32
    %53 = tpu.assume_multiple %52, 8 : i32
    %54 = arith.index_cast %53 : i32 to index
    %c0_24 = arith.constant 0 : index
    %55 = vector.load %arg6[%54, %c0_24] : memref<64x64xf32, #tpu.memory_space<vmem>>, vector<8x64xf32>
    %cst_25 = arith.constant dense<0.000000e+00> : vector<8x64xf32>
    %56 = tpu.matmul %45, %11, %cst_25 {dimension_numbers = #tpu.dot_dimension_numbers<[1], [0], [0], [1], [0, 0, 1, 1], [], []>} : vector<8x16xf32>, vector<16x64xf32>, vector<8x64xf32> -> vector<8x64xf32>
    %57 = arith.addf %55, %56 : vector<8x64xf32>
    %58 = vector.extract_strided_slice %57 {offsets = [0, 0], sizes = [8, 16], strides = [1, 1]} : vector<8x64xf32> to vector<8x16xf32>
    %59 = arith.negf %58 : vector<8x16xf32>
    %60 = math.exp %59 : vector<8x16xf32>
    %cst_26 = arith.constant 1.000000e+00 : f32
    %61 = vector.broadcast %cst_26 : f32 to vector<8x16xf32>
    %62 = arith.addf %61, %60 : vector<8x16xf32>
    %63 = arith.divf %61, %62 : vector<8x16xf32>
    %64 = vector.extract_strided_slice %57 {offsets = [0, 16], sizes = [8, 16], strides = [1, 1]} : vector<8x64xf32> to vector<8x16xf32>
    %65 = arith.negf %64 : vector<8x16xf32>
    %66 = math.exp %65 : vector<8x16xf32>
    %cst_27 = arith.constant 1.000000e+00 : f32
    %67 = vector.broadcast %cst_27 : f32 to vector<8x16xf32>
    %68 = arith.addf %67, %66 : vector<8x16xf32>
    %69 = arith.divf %67, %68 : vector<8x16xf32>
    %70 = vector.extract_strided_slice %57 {offsets = [0, 32], sizes = [8, 16], strides = [1, 1]} : vector<8x64xf32> to vector<8x16xf32>
    %71 = math.tanh %70 : vector<8x16xf32>
    %72 = vector.extract_strided_slice %57 {offsets = [0, 48], sizes = [8, 16], strides = [1, 1]} : vector<8x64xf32> to vector<8x16xf32>
    %73 = arith.negf %72 : vector<8x16xf32>
    %74 = math.exp %73 : vector<8x16xf32>
    %cst_28 = arith.constant 1.000000e+00 : f32
    %75 = vector.broadcast %cst_28 : f32 to vector<8x16xf32>
    %76 = arith.addf %75, %74 : vector<8x16xf32>
    %77 = arith.divf %75, %76 : vector<8x16xf32>
    %78 = arith.mulf %69, %43 : vector<8x16xf32>
    %79 = arith.mulf %63, %71 : vector<8x16xf32>
    %80 = arith.addf %78, %79 : vector<8x16xf32>
    %81 = math.tanh %80 : vector<8x16xf32>
    %82 = arith.mulf %77, %81 : vector<8x16xf32>
    %c0_29 = arith.constant 0 : index
    %83 = arith.index_cast %51 : i32 to index
    %c0_30 = arith.constant 0 : index
    %c0_31 = arith.constant 0 : index
    %84 = vector.load %arg5[%c0_29, %83, %c0_30, %c0_31] : memref<1x8x8x16xf32, #tpu.memory_space<vmem>>, vector<1x1x8x16xf32>
    %85 = vector.shape_cast %84 : vector<1x1x8x16xf32> to vector<8x16xf32>
    %86 = vector.shape_cast %82 : vector<8x16xf32> to vector<1x1x8x16xf32>
    tpu.vector_store %arg5[%c0_29, %83, %c0_30, %c0_31], %86 {strides = array<i32>} : memref<1x8x8x16xf32, #tpu.memory_space<vmem>>, vector<1x1x8x16xf32>,
    %c2_i32 = arith.constant 2 : i32
    %c7_i32_32 = arith.constant 7 : i32
    %87 = arith.subi %c7_i32_32, %c2_i32 : i32
    %88 = arith.select %0, %87, %c2_i32 : i32
    %c8_i32_33 = arith.constant 8 : i32
    %89 = arith.muli %88, %c8_i32_33 : i32
    %90 = tpu.assume_multiple %89, 8 : i32
    %91 = arith.index_cast %90 : i32 to index
    %c0_34 = arith.constant 0 : index
    %92 = vector.load %arg6[%91, %c0_34] : memref<64x64xf32, #tpu.memory_space<vmem>>, vector<8x64xf32>
    %cst_35 = arith.constant dense<0.000000e+00> : vector<8x64xf32>
    %93 = tpu.matmul %82, %11, %cst_35 {dimension_numbers = #tpu.dot_dimension_numbers<[1], [0], [0], [1], [0, 0, 1, 1], [], []>} : vector<8x16xf32>, vector<16x64xf32>, vector<8x64xf32> -> vector<8x64xf32>
    %94 = arith.addf %92, %93 : vector<8x64xf32>
    %95 = vector.extract_strided_slice %94 {offsets = [0, 0], sizes = [8, 16], strides = [1, 1]} : vector<8x64xf32> to vector<8x16xf32>
    %96 = arith.negf %95 : vector<8x16xf32>
    %97 = math.exp %96 : vector<8x16xf32>
    %cst_36 = arith.constant 1.000000e+00 : f32
    %98 = vector.broadcast %cst_36 : f32 to vector<8x16xf32>
    %99 = arith.addf %98, %97 : vector<8x16xf32>
    %100 = arith.divf %98, %99 : vector<8x16xf32>
    %101 = vector.extract_strided_slice %94 {offsets = [0, 16], sizes = [8, 16], strides = [1, 1]} : vector<8x64xf32> to vector<8x16xf32>
    %102 = arith.negf %101 : vector<8x16xf32>
    %103 = math.exp %102 : vector<8x16xf32>
    %cst_37 = arith.constant 1.000000e+00 : f32
    %104 = vector.broadcast %cst_37 : f32 to vector<8x16xf32>
    %105 = arith.addf %104, %103 : vector<8x16xf32>
    %106 = arith.divf %104, %105 : vector<8x16xf32>
    %107 = vector.extract_strided_slice %94 {offsets = [0, 32], sizes = [8, 16], strides = [1, 1]} : vector<8x64xf32> to vector<8x16xf32>
    %108 = math.tanh %107 : vector<8x16xf32>
    %109 = vector.extract_strided_slice %94 {offsets = [0, 48], sizes = [8, 16], strides = [1, 1]} : vector<8x64xf32> to vector<8x16xf32>
    %110 = arith.negf %109 : vector<8x16xf32>
    %111 = math.exp %110 : vector<8x16xf32>
    %cst_38 = arith.constant 1.000000e+00 : f32
    %112 = vector.broadcast %cst_38 : f32 to vector<8x16xf32>
    %113 = arith.addf %112, %111 : vector<8x16xf32>
    %114 = arith.divf %112, %113 : vector<8x16xf32>
    %115 = arith.mulf %106, %80 : vector<8x16xf32>
    %116 = arith.mulf %100, %108 : vector<8x16xf32>
    %117 = arith.addf %115, %116 : vector<8x16xf32>
    %118 = math.tanh %117 : vector<8x16xf32>
    %119 = arith.mulf %114, %118 : vector<8x16xf32>
    %c0_39 = arith.constant 0 : index
    %120 = arith.index_cast %88 : i32 to index
    %c0_40 = arith.constant 0 : index
    %c0_41 = arith.constant 0 : index
    %121 = vector.load %arg5[%c0_39, %120, %c0_40, %c0_41] : memref<1x8x8x16xf32, #tpu.memory_space<vmem>>, vector<1x1x8x16xf32>
    %122 = vector.shape_cast %121 : vector<1x1x8x16xf32> to vector<8x16xf32>
    %123 = vector.shape_cast %119 : vector<8x16xf32> to vector<1x1x8x16xf32>
    tpu.vector_store %arg5[%c0_39, %120, %c0_40, %c0_41], %123 {strides = array<i32>} : memref<1x8x8x16xf32, #tpu.memory_space<vmem>>, vector<1x1x8x16xf32>,
    %c3_i32 = arith.constant 3 : i32
    %c7_i32_42 = arith.constant 7 : i32
    %124 = arith.subi %c7_i32_42, %c3_i32 : i32
    %125 = arith.select %0, %124, %c3_i32 : i32
    %c8_i32_43 = arith.constant 8 : i32
    %126 = arith.muli %125, %c8_i32_43 : i32
    %127 = tpu.assume_multiple %126, 8 : i32
    %128 = arith.index_cast %127 : i32 to index
    %c0_44 = arith.constant 0 : index
    %129 = vector.load %arg6[%128, %c0_44] : memref<64x64xf32, #tpu.memory_space<vmem>>, vector<8x64xf32>
    %cst_45 = arith.constant dense<0.000000e+00> : vector<8x64xf32>
    %130 = tpu.matmul %119, %11, %cst_45 {dimension_numbers = #tpu.dot_dimension_numbers<[1], [0], [0], [1], [0, 0, 1, 1], [], []>} : vector<8x16xf32>, vector<16x64xf32>, vector<8x64xf32> -> vector<8x64xf32>
    %131 = arith.addf %129, %130 : vector<8x64xf32>
    %132 = vector.extract_strided_slice %131 {offsets = [0, 0], sizes = [8, 16], strides = [1, 1]} : vector<8x64xf32> to vector<8x16xf32>
    %133 = arith.negf %132 : vector<8x16xf32>
    %134 = math.exp %133 : vector<8x16xf32>
    %cst_46 = arith.constant 1.000000e+00 : f32
    %135 = vector.broadcast %cst_46 : f32 to vector<8x16xf32>
    %136 = arith.addf %135, %134 : vector<8x16xf32>
    %137 = arith.divf %135, %136 : vector<8x16xf32>
    %138 = vector.extract_strided_slice %131 {offsets = [0, 16], sizes = [8, 16], strides = [1, 1]} : vector<8x64xf32> to vector<8x16xf32>
    %139 = arith.negf %138 : vector<8x16xf32>
    %140 = math.exp %139 : vector<8x16xf32>
    %cst_47 = arith.constant 1.000000e+00 : f32
    %141 = vector.broadcast %cst_47 : f32 to vector<8x16xf32>
    %142 = arith.addf %141, %140 : vector<8x16xf32>
    %143 = arith.divf %141, %142 : vector<8x16xf32>
    %144 = vector.extract_strided_slice %131 {offsets = [0, 32], sizes = [8, 16], strides = [1, 1]} : vector<8x64xf32> to vector<8x16xf32>
    %145 = math.tanh %144 : vector<8x16xf32>
    %146 = vector.extract_strided_slice %131 {offsets = [0, 48], sizes = [8, 16], strides = [1, 1]} : vector<8x64xf32> to vector<8x16xf32>
    %147 = arith.negf %146 : vector<8x16xf32>
    %148 = math.exp %147 : vector<8x16xf32>
    %cst_48 = arith.constant 1.000000e+00 : f32
    %149 = vector.broadcast %cst_48 : f32 to vector<8x16xf32>
    %150 = arith.addf %149, %148 : vector<8x16xf32>
    %151 = arith.divf %149, %150 : vector<8x16xf32>
    %152 = arith.mulf %143, %117 : vector<8x16xf32>
    %153 = arith.mulf %137, %145 : vector<8x16xf32>
    %154 = arith.addf %152, %153 : vector<8x16xf32>
    %155 = math.tanh %154 : vector<8x16xf32>
    %156 = arith.mulf %151, %155 : vector<8x16xf32>
    %c0_49 = arith.constant 0 : index
    %157 = arith.index_cast %125 : i32 to index
    %c0_50 = arith.constant 0 : index
    %c0_51 = arith.constant 0 : index
    %158 = vector.load %arg5[%c0_49, %157, %c0_50, %c0_51] : memref<1x8x8x16xf32, #tpu.memory_space<vmem>>, vector<1x1x8x16xf32>
    %159 = vector.shape_cast %158 : vector<1x1x8x16xf32> to vector<8x16xf32>
    %160 = vector.shape_cast %156 : vector<8x16xf32> to vector<1x1x8x16xf32>
    tpu.vector_store %arg5[%c0_49, %157, %c0_50, %c0_51], %160 {strides = array<i32>} : memref<1x8x8x16xf32, #tpu.memory_space<vmem>>, vector<1x1x8x16xf32>,
    %c4_i32 = arith.constant 4 : i32
    %c7_i32_52 = arith.constant 7 : i32
    %161 = arith.subi %c7_i32_52, %c4_i32 : i32
    %162 = arith.select %0, %161, %c4_i32 : i32
    %c8_i32_53 = arith.constant 8 : i32
    %163 = arith.muli %162, %c8_i32_53 : i32
    %164 = tpu.assume_multiple %163, 8 : i32
    %165 = arith.index_cast %164 : i32 to index
    %c0_54 = arith.constant 0 : index
    %166 = vector.load %arg6[%165, %c0_54] : memref<64x64xf32, #tpu.memory_space<vmem>>, vector<8x64xf32>
    %cst_55 = arith.constant dense<0.000000e+00> : vector<8x64xf32>
    %167 = tpu.matmul %156, %11, %cst_55 {dimension_numbers = #tpu.dot_dimension_numbers<[1], [0], [0], [1], [0, 0, 1, 1], [], []>} : vector<8x16xf32>, vector<16x64xf32>, vector<8x64xf32> -> vector<8x64xf32>
    %168 = arith.addf %166, %167 : vector<8x64xf32>
    %169 = vector.extract_strided_slice %168 {offsets = [0, 0], sizes = [8, 16], strides = [1, 1]} : vector<8x64xf32> to vector<8x16xf32>
    %170 = arith.negf %169 : vector<8x16xf32>
    %171 = math.exp %170 : vector<8x16xf32>
    %cst_56 = arith.constant 1.000000e+00 : f32
    %172 = vector.broadcast %cst_56 : f32 to vector<8x16xf32>
    %173 = arith.addf %172, %171 : vector<8x16xf32>
    %174 = arith.divf %172, %173 : vector<8x16xf32>
    %175 = vector.extract_strided_slice %168 {offsets = [0, 16], sizes = [8, 16], strides = [1, 1]} : vector<8x64xf32> to vector<8x16xf32>
    %176 = arith.negf %175 : vector<8x16xf32>
    %177 = math.exp %176 : vector<8x16xf32>
    %cst_57 = arith.constant 1.000000e+00 : f32
    %178 = vector.broadcast %cst_57 : f32 to vector<8x16xf32>
    %179 = arith.addf %178, %177 : vector<8x16xf32>
    %180 = arith.divf %178, %179 : vector<8x16xf32>
    %181 = vector.extract_strided_slice %168 {offsets = [0, 32], sizes = [8, 16], strides = [1, 1]} : vector<8x64xf32> to vector<8x16xf32>
    %182 = math.tanh %181 : vector<8x16xf32>
    %183 = vector.extract_strided_slice %168 {offsets = [0, 48], sizes = [8, 16], strides = [1, 1]} : vector<8x64xf32> to vector<8x16xf32>
    %184 = arith.negf %183 : vector<8x16xf32>
    %185 = math.exp %184 : vector<8x16xf32>
    %cst_58 = arith.constant 1.000000e+00 : f32
    %186 = vector.broadcast %cst_58 : f32 to vector<8x16xf32>
    %187 = arith.addf %186, %185 : vector<8x16xf32>
    %188 = arith.divf %186, %187 : vector<8x16xf32>
    %189 = arith.mulf %180, %154 : vector<8x16xf32>
    %190 = arith.mulf %174, %182 : vector<8x16xf32>
    %191 = arith.addf %189, %190 : vector<8x16xf32>
    %192 = math.tanh %191 : vector<8x16xf32>
    %193 = arith.mulf %188, %192 : vector<8x16xf32>
    %c0_59 = arith.constant 0 : index
    %194 = arith.index_cast %162 : i32 to index
    %c0_60 = arith.constant 0 : index
    %c0_61 = arith.constant 0 : index
    %195 = vector.load %arg5[%c0_59, %194, %c0_60, %c0_61] : memref<1x8x8x16xf32, #tpu.memory_space<vmem>>, vector<1x1x8x16xf32>
    %196 = vector.shape_cast %195 : vector<1x1x8x16xf32> to vector<8x16xf32>
    %197 = vector.shape_cast %193 : vector<8x16xf32> to vector<1x1x8x16xf32>
    tpu.vector_store %arg5[%c0_59, %194, %c0_60, %c0_61], %197 {strides = array<i32>} : memref<1x8x8x16xf32, #tpu.memory_space<vmem>>, vector<1x1x8x16xf32>,
    %c5_i32 = arith.constant 5 : i32
    %c7_i32_62 = arith.constant 7 : i32
    %198 = arith.subi %c7_i32_62, %c5_i32 : i32
    %199 = arith.select %0, %198, %c5_i32 : i32
    %c8_i32_63 = arith.constant 8 : i32
    %200 = arith.muli %199, %c8_i32_63 : i32
    %201 = tpu.assume_multiple %200, 8 : i32
    %202 = arith.index_cast %201 : i32 to index
    %c0_64 = arith.constant 0 : index
    %203 = vector.load %arg6[%202, %c0_64] : memref<64x64xf32, #tpu.memory_space<vmem>>, vector<8x64xf32>
    %cst_65 = arith.constant dense<0.000000e+00> : vector<8x64xf32>
    %204 = tpu.matmul %193, %11, %cst_65 {dimension_numbers = #tpu.dot_dimension_numbers<[1], [0], [0], [1], [0, 0, 1, 1], [], []>} : vector<8x16xf32>, vector<16x64xf32>, vector<8x64xf32> -> vector<8x64xf32>
    %205 = arith.addf %203, %204 : vector<8x64xf32>
    %206 = vector.extract_strided_slice %205 {offsets = [0, 0], sizes = [8, 16], strides = [1, 1]} : vector<8x64xf32> to vector<8x16xf32>
    %207 = arith.negf %206 : vector<8x16xf32>
    %208 = math.exp %207 : vector<8x16xf32>
    %cst_66 = arith.constant 1.000000e+00 : f32
    %209 = vector.broadcast %cst_66 : f32 to vector<8x16xf32>
    %210 = arith.addf %209, %208 : vector<8x16xf32>
    %211 = arith.divf %209, %210 : vector<8x16xf32>
    %212 = vector.extract_strided_slice %205 {offsets = [0, 16], sizes = [8, 16], strides = [1, 1]} : vector<8x64xf32> to vector<8x16xf32>
    %213 = arith.negf %212 : vector<8x16xf32>
    %214 = math.exp %213 : vector<8x16xf32>
    %cst_67 = arith.constant 1.000000e+00 : f32
    %215 = vector.broadcast %cst_67 : f32 to vector<8x16xf32>
    %216 = arith.addf %215, %214 : vector<8x16xf32>
    %217 = arith.divf %215, %216 : vector<8x16xf32>
    %218 = vector.extract_strided_slice %205 {offsets = [0, 32], sizes = [8, 16], strides = [1, 1]} : vector<8x64xf32> to vector<8x16xf32>
    %219 = math.tanh %218 : vector<8x16xf32>
    %220 = vector.extract_strided_slice %205 {offsets = [0, 48], sizes = [8, 16], strides = [1, 1]} : vector<8x64xf32> to vector<8x16xf32>
    %221 = arith.negf %220 : vector<8x16xf32>
    %222 = math.exp %221 : vector<8x16xf32>
    %cst_68 = arith.constant 1.000000e+00 : f32
    %223 = vector.broadcast %cst_68 : f32 to vector<8x16xf32>
    %224 = arith.addf %223, %222 : vector<8x16xf32>
    %225 = arith.divf %223, %224 : vector<8x16xf32>
    %226 = arith.mulf %217, %191 : vector<8x16xf32>
    %227 = arith.mulf %211, %219 : vector<8x16xf32>
    %228 = arith.addf %226, %227 : vector<8x16xf32>
    %229 = math.tanh %228 : vector<8x16xf32>
    %230 = arith.mulf %225, %229 : vector<8x16xf32>
    %c0_69 = arith.constant 0 : index
    %231 = arith.index_cast %199 : i32 to index
    %c0_70 = arith.constant 0 : index
    %c0_71 = arith.constant 0 : index
    %232 = vector.load %arg5[%c0_69, %231, %c0_70, %c0_71] : memref<1x8x8x16xf32, #tpu.memory_space<vmem>>, vector<1x1x8x16xf32>
    %233 = vector.shape_cast %232 : vector<1x1x8x16xf32> to vector<8x16xf32>
    %234 = vector.shape_cast %230 : vector<8x16xf32> to vector<1x1x8x16xf32>
    tpu.vector_store %arg5[%c0_69, %231, %c0_70, %c0_71], %234 {strides = array<i32>} : memref<1x8x8x16xf32, #tpu.memory_space<vmem>>, vector<1x1x8x16xf32>,
    %c6_i32 = arith.constant 6 : i32
    %c7_i32_72 = arith.constant 7 : i32
    %235 = arith.subi %c7_i32_72, %c6_i32 : i32
    %236 = arith.select %0, %235, %c6_i32 : i32
    %c8_i32_73 = arith.constant 8 : i32
    %237 = arith.muli %236, %c8_i32_73 : i32
    %238 = tpu.assume_multiple %237, 8 : i32
    %239 = arith.index_cast %238 : i32 to index
    %c0_74 = arith.constant 0 : index
    %240 = vector.load %arg6[%239, %c0_74] : memref<64x64xf32, #tpu.memory_space<vmem>>, vector<8x64xf32>
    %cst_75 = arith.constant dense<0.000000e+00> : vector<8x64xf32>
    %241 = tpu.matmul %230, %11, %cst_75 {dimension_numbers = #tpu.dot_dimension_numbers<[1], [0], [0], [1], [0, 0, 1, 1], [], []>} : vector<8x16xf32>, vector<16x64xf32>, vector<8x64xf32> -> vector<8x64xf32>
    %242 = arith.addf %240, %241 : vector<8x64xf32>
    %243 = vector.extract_strided_slice %242 {offsets = [0, 0], sizes = [8, 16], strides = [1, 1]} : vector<8x64xf32> to vector<8x16xf32>
    %244 = arith.negf %243 : vector<8x16xf32>
    %245 = math.exp %244 : vector<8x16xf32>
    %cst_76 = arith.constant 1.000000e+00 : f32
    %246 = vector.broadcast %cst_76 : f32 to vector<8x16xf32>
    %247 = arith.addf %246, %245 : vector<8x16xf32>
    %248 = arith.divf %246, %247 : vector<8x16xf32>
    %249 = vector.extract_strided_slice %242 {offsets = [0, 16], sizes = [8, 16], strides = [1, 1]} : vector<8x64xf32> to vector<8x16xf32>
    %250 = arith.negf %249 : vector<8x16xf32>
    %251 = math.exp %250 : vector<8x16xf32>
    %cst_77 = arith.constant 1.000000e+00 : f32
    %252 = vector.broadcast %cst_77 : f32 to vector<8x16xf32>
    %253 = arith.addf %252, %251 : vector<8x16xf32>
    %254 = arith.divf %252, %253 : vector<8x16xf32>
    %255 = vector.extract_strided_slice %242 {offsets = [0, 32], sizes = [8, 16], strides = [1, 1]} : vector<8x64xf32> to vector<8x16xf32>
    %256 = math.tanh %255 : vector<8x16xf32>
    %257 = vector.extract_strided_slice %242 {offsets = [0, 48], sizes = [8, 16], strides = [1, 1]} : vector<8x64xf32> to vector<8x16xf32>
    %258 = arith.negf %257 : vector<8x16xf32>
    %259 = math.exp %258 : vector<8x16xf32>
    %cst_78 = arith.constant 1.000000e+00 : f32
    %260 = vector.broadcast %cst_78 : f32 to vector<8x16xf32>
    %261 = arith.addf %260, %259 : vector<8x16xf32>
    %262 = arith.divf %260, %261 : vector<8x16xf32>
    %263 = arith.mulf %254, %228 : vector<8x16xf32>
    %264 = arith.mulf %248, %256 : vector<8x16xf32>
    %265 = arith.addf %263, %264 : vector<8x16xf32>
    %266 = math.tanh %265 : vector<8x16xf32>
    %267 = arith.mulf %262, %266 : vector<8x16xf32>
    %c0_79 = arith.constant 0 : index
    %268 = arith.index_cast %236 : i32 to index
    %c0_80 = arith.constant 0 : index
    %c0_81 = arith.constant 0 : index
    %269 = vector.load %arg5[%c0_79, %268, %c0_80, %c0_81] : memref<1x8x8x16xf32, #tpu.memory_space<vmem>>, vector<1x1x8x16xf32>
    %270 = vector.shape_cast %269 : vector<1x1x8x16xf32> to vector<8x16xf32>
    %271 = vector.shape_cast %267 : vector<8x16xf32> to vector<1x1x8x16xf32>
    tpu.vector_store %arg5[%c0_79, %268, %c0_80, %c0_81], %271 {strides = array<i32>} : memref<1x8x8x16xf32, #tpu.memory_space<vmem>>, vector<1x1x8x16xf32>,
    %c7_i32_82 = arith.constant 7 : i32
    %c7_i32_83 = arith.constant 7 : i32
    %272 = arith.subi %c7_i32_83, %c7_i32_82 : i32
    %273 = arith.select %0, %272, %c7_i32_82 : i32
    %c8_i32_84 = arith.constant 8 : i32
    %274 = arith.muli %273, %c8_i32_84 : i32
    %275 = tpu.assume_multiple %274, 8 : i32
    %276 = arith.index_cast %275 : i32 to index
    %c0_85 = arith.constant 0 : index
    %277 = vector.load %arg6[%276, %c0_85] : memref<64x64xf32, #tpu.memory_space<vmem>>, vector<8x64xf32>
    %cst_86 = arith.constant dense<0.000000e+00> : vector<8x64xf32>
    %278 = tpu.matmul %267, %11, %cst_86 {dimension_numbers = #tpu.dot_dimension_numbers<[1], [0], [0], [1], [0, 0, 1, 1], [], []>} : vector<8x16xf32>, vector<16x64xf32>, vector<8x64xf32> -> vector<8x64xf32>
    %279 = arith.addf %277, %278 : vector<8x64xf32>
    %280 = vector.extract_strided_slice %279 {offsets = [0, 0], sizes = [8, 16], strides = [1, 1]} : vector<8x64xf32> to vector<8x16xf32>
    %281 = arith.negf %280 : vector<8x16xf32>
    %282 = math.exp %281 : vector<8x16xf32>
    %cst_87 = arith.constant 1.000000e+00 : f32
    %283 = vector.broadcast %cst_87 : f32 to vector<8x16xf32>
    %284 = arith.addf %283, %282 : vector<8x16xf32>
    %285 = arith.divf %283, %284 : vector<8x16xf32>
    %286 = vector.extract_strided_slice %279 {offsets = [0, 16], sizes = [8, 16], strides = [1, 1]} : vector<8x64xf32> to vector<8x16xf32>
    %287 = arith.negf %286 : vector<8x16xf32>
    %288 = math.exp %287 : vector<8x16xf32>
    %cst_88 = arith.constant 1.000000e+00 : f32
    %289 = vector.broadcast %cst_88 : f32 to vector<8x16xf32>
    %290 = arith.addf %289, %288 : vector<8x16xf32>
    %291 = arith.divf %289, %290 : vector<8x16xf32>
    %292 = vector.extract_strided_slice %279 {offsets = [0, 32], sizes = [8, 16], strides = [1, 1]} : vector<8x64xf32> to vector<8x16xf32>
    %293 = math.tanh %292 : vector<8x16xf32>
    %294 = vector.extract_strided_slice %279 {offsets = [0, 48], sizes = [8, 16], strides = [1, 1]} : vector<8x64xf32> to vector<8x16xf32>
    %295 = arith.negf %294 : vector<8x16xf32>
    %296 = math.exp %295 : vector<8x16xf32>
    %cst_89 = arith.constant 1.000000e+00 : f32
    %297 = vector.broadcast %cst_89 : f32 to vector<8x16xf32>
    %298 = arith.addf %297, %296 : vector<8x16xf32>
    %299 = arith.divf %297, %298 : vector<8x16xf32>
    %300 = arith.mulf %291, %265 : vector<8x16xf32>
    %301 = arith.mulf %285, %293 : vector<8x16xf32>
    %302 = arith.addf %300, %301 : vector<8x16xf32>
    %303 = math.tanh %302 : vector<8x16xf32>
    %304 = arith.mulf %299, %303 : vector<8x16xf32>
    %c0_90 = arith.constant 0 : index
    %305 = arith.index_cast %273 : i32 to index
    %c0_91 = arith.constant 0 : index
    %c0_92 = arith.constant 0 : index
    %306 = vector.load %arg5[%c0_90, %305, %c0_91, %c0_92] : memref<1x8x8x16xf32, #tpu.memory_space<vmem>>, vector<1x1x8x16xf32>
    %307 = vector.shape_cast %306 : vector<1x1x8x16xf32> to vector<8x16xf32>
    %308 = vector.shape_cast %304 : vector<8x16xf32> to vector<1x1x8x16xf32>
    tpu.vector_store %arg5[%c0_90, %305, %c0_91, %c0_92], %308 {strides = array<i32>} : memref<1x8x8x16xf32, #tpu.memory_space<vmem>>, vector<1x1x8x16xf32>,
    %c8_i32_93 = arith.constant 8 : i32
    return
  }
  func.func @transform_0(%arg0: i32) -> (i32, i32) {
    %c0_i32 = arith.constant 0 : i32
    %c0_i32_0 = arith.constant 0 : i32
    %c0_i32_1 = arith.constant 0 : i32
    return %c0_i32, %c0_i32_0 : i32, i32
  }
  func.func @transform_1(%arg0: i32) -> (i32, i32, i32) {
    %c0_i32 = arith.constant 0 : i32
    %c0_i32_0 = arith.constant 0 : i32
    %c0_i32_1 = arith.constant 0 : i32
    return %arg0, %c0_i32, %c0_i32_0 : i32, i32, i32
  }
  func.func @transform_2(%arg0: i32) -> (i32, i32, i32) {
    %c0_i32 = arith.constant 0 : i32
    %c0_i32_0 = arith.constant 0 : i32
    %c0_i32_1 = arith.constant 0 : i32
    return %arg0, %c0_i32, %c0_i32_0 : i32, i32, i32
  }
  func.func @transform_3(%arg0: i32) -> (i32, i32, i32) {
    %c0_i32 = arith.constant 0 : i32
    %c0_i32_0 = arith.constant 0 : i32
    %c0_i32_1 = arith.constant 0 : i32
    return %arg0, %c0_i32, %c0_i32_0 : i32, i32, i32
  }
  func.func @transform_4(%arg0: i32) -> (i32, i32, i32, i32) {
    %c0_i32 = arith.constant 0 : i32
    %c0_i32_0 = arith.constant 0 : i32
    %c0_i32_1 = arith.constant 0 : i32
    %c0_i32_2 = arith.constant 0 : i32
    return %arg0, %c0_i32, %c0_i32_0, %c0_i32_1 : i32, i32, i32, i32
  }
}

module attributes {stable_mosaic.version = 11 : i64} {
  func.func @_attn_head_kernel(%arg0: i32, %arg1: memref<1x16x32xf32, #tpu.memory_space<vmem>>, %arg2: memref<1x8x32xf32, #tpu.memory_space<vmem>>, %arg3: memref<32x32xf32, #tpu.memory_space<vmem>>, %arg4: memref<32x128xf32, #tpu.memory_space<vmem>>, %arg5: memref<32x128xf32, #tpu.memory_space<vmem>>, %arg6: memref<1x1x128xf32, #tpu.memory_space<vmem>>, %arg7: memref<1x16x128xf32, #tpu.memory_space<vmem>>) attributes {dimension_semantics = [#tpu.dimension_semantics<parallel>], iteration_bounds = array<i64: 2>, scalar_prefetch = 0 : i64, scratch_operands = 0 : i64, tpu.core_type = #tpu.core_type<tc>, window_params = [{transform_indices = @transform_0, window_bounds = array<i64: 1, 16, 32>}, {transform_indices = @transform_1, window_bounds = array<i64: 1, 8, 32>}, {pipeline_mode = #tpu.pipeline_mode<synchronous>, transform_indices = @transform_2, window_bounds = array<i64: 32, 32>}, {pipeline_mode = #tpu.pipeline_mode<synchronous>, transform_indices = @transform_3, window_bounds = array<i64: 32, 128>}, {pipeline_mode = #tpu.pipeline_mode<synchronous>, transform_indices = @transform_4, window_bounds = array<i64: 32, 128>}, {transform_indices = @transform_5, window_bounds = array<i64: 1, 1, 128>}, {transform_indices = @transform_6, window_bounds = array<i64: 1, 16, 128>}]} {
    %c0 = arith.constant 0 : index
    %c0_0 = arith.constant 0 : index
    %c0_1 = arith.constant 0 : index
    %0 = vector.load %arg1[%c0, %c0_0, %c0_1] : memref<1x16x32xf32, #tpu.memory_space<vmem>>, vector<1x16x32xf32>
    %1 = vector.shape_cast %0 : vector<1x16x32xf32> to vector<16x32xf32>
    %c0_2 = arith.constant 0 : index
    %c0_3 = arith.constant 0 : index
    %c0_4 = arith.constant 0 : index
    %2 = vector.load %arg2[%c0_2, %c0_3, %c0_4] : memref<1x8x32xf32, #tpu.memory_space<vmem>>, vector<1x8x32xf32>
    %3 = vector.shape_cast %2 : vector<1x8x32xf32> to vector<8x32xf32>
    %c0_5 = arith.constant 0 : index
    %c0_6 = arith.constant 0 : index
    %4 = vector.load %arg3[%c0_5, %c0_6] : memref<32x32xf32, #tpu.memory_space<vmem>>, vector<32x32xf32>
    %cst = arith.constant dense<0.000000e+00> : vector<8x32xf32>
    %5 = tpu.matmul %3, %4, %cst {dimension_numbers = #tpu.dot_dimension_numbers<[1], [0], [0], [1], [0, 0, 1, 1], [], []>} : vector<8x32xf32>, vector<32x32xf32>, vector<8x32xf32> -> vector<8x32xf32>
    %cst_7 = arith.constant dense<0.000000e+00> : vector<16x8xf32>
    %6 = tpu.matmul %1, %5, %cst_7 {dimension_numbers = #tpu.dot_dimension_numbers<[1], [1], [0], [0], [0, 0, 1, 0], [], []>} : vector<16x32xf32>, vector<8x32xf32>, vector<16x8xf32> -> vector<16x8xf32>
    %cst_8 = arith.constant dense<0xFF800000> : vector<16xf32>
    %7 = vector.multi_reduction <maximumf>, %6, %cst_8 [1] : vector<16x8xf32> to vector<16xf32>
    %8 = vector.shape_cast %7 : vector<16xf32> to vector<16x1xf32>
    %9 = vector.broadcast %8 : vector<16x1xf32> to vector<16x8xf32>
    %10 = arith.subf %6, %9 : vector<16x8xf32>
    %11 = math.exp %10 : vector<16x8xf32>
    %cst_9 = arith.constant dense<0.000000e+00> : vector<16xf32>
    %12 = vector.multi_reduction <add>, %11, %cst_9 [1] : vector<16x8xf32> to vector<16xf32>
    %13 = vector.shape_cast %12 : vector<16xf32> to vector<16x1xf32>
    %cst_10 = arith.constant 1.000000e-30 : f32
    %14 = vector.broadcast %cst_10 : f32 to vector<16x1xf32>
    %15 = arith.addf %13, %14 : vector<16x1xf32>
    %16 = tpu.reciprocal %15 : vector<16x1xf32> -> vector<16x1xf32>
    %17 = vector.broadcast %16 : vector<16x1xf32> to vector<16x8xf32>
    %18 = arith.mulf %11, %17 : vector<16x8xf32>
    %c0_11 = arith.constant 0 : index
    %c0_12 = arith.constant 0 : index
    %19 = vector.load %arg5[%c0_11, %c0_12] : memref<32x128xf32, #tpu.memory_space<vmem>>, vector<32x128xf32>
    %cst_13 = arith.constant dense<0.000000e+00> : vector<8x128xf32>
    %20 = tpu.matmul %3, %19, %cst_13 {dimension_numbers = #tpu.dot_dimension_numbers<[1], [0], [0], [1], [0, 0, 1, 1], [], []>} : vector<8x32xf32>, vector<32x128xf32>, vector<8x128xf32> -> vector<8x128xf32>
    %c0_14 = arith.constant 0 : index
    %c0_15 = arith.constant 0 : index
    %21 = vector.load %arg4[%c0_14, %c0_15] : memref<32x128xf32, #tpu.memory_space<vmem>>, vector<32x128xf32>
    %cst_16 = arith.constant dense<0.000000e+00> : vector<16x128xf32>
    %22 = tpu.matmul %1, %21, %cst_16 {dimension_numbers = #tpu.dot_dimension_numbers<[1], [0], [0], [1], [0, 0, 1, 1], [], []>} : vector<16x32xf32>, vector<32x128xf32>, vector<16x128xf32> -> vector<16x128xf32>
    %cst_17 = arith.constant dense<0.000000e+00> : vector<16x128xf32>
    %23 = tpu.matmul %18, %20, %cst_17 {dimension_numbers = #tpu.dot_dimension_numbers<[1], [0], [0], [1], [0, 0, 1, 1], [], []>} : vector<16x8xf32>, vector<8x128xf32>, vector<16x128xf32> -> vector<16x128xf32>
    %24 = arith.addf %22, %23 : vector<16x128xf32>
    %c0_18 = arith.constant 0 : index
    %c0_19 = arith.constant 0 : index
    %c0_20 = arith.constant 0 : index
    %25 = vector.load %arg6[%c0_18, %c0_19, %c0_20] : memref<1x1x128xf32, #tpu.memory_space<vmem>>, vector<1x1x128xf32>
    %26 = vector.shape_cast %25 : vector<1x1x128xf32> to vector<1x128xf32>
    %27 = vector.broadcast %26 : vector<1x128xf32> to vector<16x128xf32>
    %28 = arith.addf %24, %27 : vector<16x128xf32>
    %c0_21 = arith.constant 0 : index
    %c0_22 = arith.constant 0 : index
    %c0_23 = arith.constant 0 : index
    %29 = vector.load %arg7[%c0_21, %c0_22, %c0_23] : memref<1x16x128xf32, #tpu.memory_space<vmem>>, vector<1x16x128xf32>
    %30 = vector.shape_cast %29 : vector<1x16x128xf32> to vector<16x128xf32>
    %31 = vector.shape_cast %28 : vector<16x128xf32> to vector<1x16x128xf32>
    tpu.vector_store %arg7[%c0_21, %c0_22, %c0_23], %31 {strides = array<i32>} : memref<1x16x128xf32, #tpu.memory_space<vmem>>, vector<1x16x128xf32>,
    return
  }
  func.func @transform_0(%arg0: i32) -> (i32, i32, i32) {
    %c0_i32 = arith.constant 0 : i32
    %c0_i32_0 = arith.constant 0 : i32
    %c0_i32_1 = arith.constant 0 : i32
    return %arg0, %c0_i32, %c0_i32_0 : i32, i32, i32
  }
  func.func @transform_1(%arg0: i32) -> (i32, i32, i32) {
    %c0_i32 = arith.constant 0 : i32
    %c0_i32_0 = arith.constant 0 : i32
    %c0_i32_1 = arith.constant 0 : i32
    return %arg0, %c0_i32, %c0_i32_0 : i32, i32, i32
  }
  func.func @transform_2(%arg0: i32) -> (i32, i32) {
    %c0_i32 = arith.constant 0 : i32
    %c0_i32_0 = arith.constant 0 : i32
    %c0_i32_1 = arith.constant 0 : i32
    return %c0_i32, %c0_i32_0 : i32, i32
  }
  func.func @transform_3(%arg0: i32) -> (i32, i32) {
    %c0_i32 = arith.constant 0 : i32
    %c0_i32_0 = arith.constant 0 : i32
    %c0_i32_1 = arith.constant 0 : i32
    return %c0_i32, %c0_i32_0 : i32, i32
  }
  func.func @transform_4(%arg0: i32) -> (i32, i32) {
    %c0_i32 = arith.constant 0 : i32
    %c0_i32_0 = arith.constant 0 : i32
    %c0_i32_1 = arith.constant 0 : i32
    return %c0_i32, %c0_i32_0 : i32, i32
  }
  func.func @transform_5(%arg0: i32) -> (i32, i32, i32) {
    %c0_i32 = arith.constant 0 : i32
    %c0_i32_0 = arith.constant 0 : i32
    %c0_i32_1 = arith.constant 0 : i32
    return %arg0, %c0_i32, %c0_i32_0 : i32, i32, i32
  }
  func.func @transform_6(%arg0: i32) -> (i32, i32, i32) {
    %c0_i32 = arith.constant 0 : i32
    %c0_i32_0 = arith.constant 0 : i32
    %c0_i32_1 = arith.constant 0 : i32
    return %arg0, %c0_i32, %c0_i32_0 : i32, i32, i32
  }
}

</mosaic_0001>

<bundles_post_ra>
// kernel: ssl_joint_forward.3
= control target key start
LH: loop header
LB: loop body
LE: loop exit
PB: predicated region body
PF: predicated region fallthrough
CT: control target
= control target key end

     0   :  { %11 = vsyncpa [#allocation3], 0  ;;  %s1248_s0 = inlined_call_operand.vmem [shape: f32[2,16,32], index: 0, kind: input, shape index: {}]   ;;  %s1249_s1 = inlined_call_operand.vmem [shape: f32[2,8,32], index: 1, kind: input, shape index: {}]   ;;  %s1250_s2 = inlined_call_operand.vmem [shape: f32[32,32], index: 2, kind: input, shape index: {}]   ;;  %s1251_s3 = inlined_call_operand.vmem [shape: f32[32,128], index: 3, kind: input, shape index: {}]   ;;  %s1252_s4 = inlined_call_operand.vmem [shape: f32[32,128], index: 4, kind: input, shape index: {}]   ;;  %s1253_s5 = inlined_call_operand.vmem [shape: f32[2,1,128], index: 5, kind: input, shape index: {}]   ;;  %s1254_s6 = inlined_call_operand.hbm [shape: f32[2,16,128], index: 6, kind: output, shape index: {}]  }
   0x1   :  { %13 = vsyncpa [#allocation3 + $0x1], 0  ;;  %s1082_s21 = smov 0   ;;  %s1084_s22 = smov 0  }
   0x2   :  { %s1086_s23 = smov 0   ;;  %s1088_s24 = smov 0  }
   0x3 LB: > { %s1103_s25 = sadd.s32 4294967295, %s1039_s24   ;;  %s813_s26 = sadd.s32 4294967294, %s1039_s24   ;;  %s1039_s24 = sphi %s1088_s24, %s1260_s24   ;;  %s1035_s23 = sphi %s1086_s23, %s1259_s23   ;;  %s1031_s22 = sphi %s1084_s22, %s1258_s22   ;;  %s1027_s21 = sphi %s1082_s21, %s1257_s21  }
   0x4   : > { %s1107_s27 = sadd.s32 1, %s1039_s24   ;;  %s167_s28 = sadd.s32 1, %s1035_s23 }
   0x5   : > { %s164_s29 = ssub.s32 %s1039_s24, %s1107_s27  ;;  %p177_p0 = scmp.ne.s32.totalorder %s1035_s23, %s1031_s22 }
   0x6   : > { %p165_p1 = scmp.eq.s32.totalorder %s164_s29, 0  ;;  %p178_p2 = scmp.eq.s32.totalorder %s1103_s25, 1 }
   0x7   : > { %p183_p3 = scmp.ne.s32.totalorder %s1031_s22, %s1027_s21  ;;  %p184_p4 = scmp.eq.s32.totalorder %s813_s26, 1 }
   0x8   : > { %s1118_s30 = scalar_select %p165_p1, %s1035_s23, %s167_s28  }
   0x9   : > { %p1120_p5 = por %p178_p2, %p177_p0  ;;  %p1124_p6 = por %p184_p4, %p183_p3 }
   0xa   : > { %p816_p7 = scmp.ge.s32.totalorder %s1039_s24, 1  ;;  %p232_p8 = scmp.lt.s32.totalorder %s1039_s24, 3 }
   0xc   : > { %p233_p9 = pnand %p816_p7, %p232_p8 }
   0xd   : > { %v284_v0 = vld [vmem:[%s1250_s2] sm:$0xff] (!%p233_p9)  ;;  %v285_v1 = vld [vmem:[%s1250_s2 + $0x8] sm:$0xff] (!%p233_p9)  ;;  %v286_v2 = vld [vmem:[%s1250_s2 + $0x10] sm:$0xff] (!%p233_p9)  ;;  %v1041_v3 = vmov (!%p233_p9), 0.0|0.0   ;;  %vm1042_vm0 = vmmov (!%p233_p9), 0   ;;  %v1043_v6 = vmov (!%p233_p9), 0.0  }
   0xe   : > { %236 = sbr.rel (%p233_p9) target bundleno = 1007 (0x3ef), region = 44  ;;  %903 = vmatprep.subr.bf16.mxu0 (!%p233_p9), %v1041_v3  ;;  %v904_v4 = vpack.c.bf16 (!%p233_p9), %v285_v1, %v284_v0  ;;  %v287_v5 = vld [vmem:[%s1250_s2 + $0x18] sm:$0xff] (!%p233_p9)  ;;  %868 = vmatprep.mubr.msk.f32.mxu0 (!%p233_p9), %vm1042_vm0, %v1043_v6  ;;  %p269_p10 = scmp.lt.s32.totalorder (!%p233_p9), %s1103_s25, 1  ;;  %vm288_vm1 = vcmask (!%p233_p9), 261120   ;;  %v471_v13 = vld [vmem:[%s1252_s4] sm:$0xff] (!%p233_p9)  ;;  %v472_v14 = vld [vmem:[%s1252_s4 + $0x8] sm:$0xff] (!%p233_p9) }
   0xf   : > { %v907_v7 = vpack.c.bf16 (!%p233_p9), %v287_v5, %v286_v2  ;;  %v473_v15 = vld [vmem:[%s1252_s4 + $0x10] sm:$0xff] (!%p233_p9)  ;;  %v910_v16 = vpack.c.bf16 (!%p233_p9), %v472_v14, %v471_v13  ;;  %v474_v17 = vld [vmem:[%s1252_s4 + $0x18] sm:$0xff] (!%p233_p9)  ;;  %vm446_vm2 = vcmask (!%p233_p9), 64512   ;;  %v545_v33 = vld [vmem:[%s1251_s3] sm:$0xff] (!%p233_p9)  ;;  %s266_s13 = sand.u32 (!%p233_p9), 1, %s1031_s22  }
  0x10   : > { %905 = vmatpush3.bf16.msra.mxu0 (!%p233_p9), %v904_v4  ;;  %v913_v18 = vpack.c.bf16 (!%p233_p9), %v474_v17, %v473_v15  ;;  %v546_v34 = vld [vmem:[%s1251_s3 + $0x8] sm:$0xff] (!%p233_p9)  ;;  %v547_v36 = vld [vmem:[%s1251_s3 + $0x10] sm:$0xff] (!%p233_p9)  ;;  %v548_v37 = vld [vmem:[%s1251_s3 + $0x18] sm:$0xff] (!%p233_p9)  ;;  %s817_s14 = sshll.u32 (!%p233_p9), %s266_s13, 4 }
  0x11   : > { %906 = vmatprep.subr.bf16.mxu0 (!%p233_p9), %v1041_v3  ;;  %v915_v35 = vpack.c.bf16 (!%p233_p9), %v546_v34, %v545_v33  ;;  %v919_v38 = vpack.c.bf16 (!%p233_p9), %v548_v37, %v547_v36  ;;  %s268_s19 = scalar_lea.vmem (!%p233_p9), [#allocation2], %s817_s14 }
  0x12   : > { %s730_s20 = sshll.u32 (!%p233_p9), %s268_s19, 4  ;;  %s1200_s20 = int_to_ptr.vmem [resolvable:$true] %s730_s20 }
  0x14   : > { %908 = vmatpush3.bf16.msra.mxu0 (!%p233_p9), %v907_v7 }
  0x15   : > { %s1145_s17 = scalar_select %p269_p10, %s1103_s25, 1  ;;  %916 = vmatprep.subr.bf16.mxu0 %v915_v35 }
  0x17   : > { %s820_s18 = sshll.u32 %s1145_s17, 3  ;;  %s836_s28 = sshll.u32 %s1145_s17, 4 }
  0x18   : > { %s277_s26 = scalar_lea.vmem %s1249_s1, %s820_s18  ;;  %s273_s10 = scalar_lea.vmem %s1248_s0, %s836_s28 }
  0x19   : > { %v283_v8 = vld [vmem:[%s277_s26] sm:$0xff]  ;;  %v282_v12 = vld [vmem:[%s273_s10 + $0x8] sm:$0xff]  ;;  %s280_s18 = scalar_lea.vmem %s1253_s5, %s1145_s17  ;;  %s837_s26 = sshll.u32 %s1103_s25, 8 }
  0x1a   : > { %869 = vmatmul.mubr.msk.f32.vlgmr.msra.gmra.mrb[0].mxu0 %vm288_vm1, %v283_v8  ;;  %v281_v9 = vld [vmem:[%s273_s10] sm:$0xff]  ;;  %s1205_s9 = scalar_lea.hbm %s1254_s6, %s837_s26  ;;  %s1207_s17 = scalar_lea.sflag [#allocation3], %s266_s13 }
  0x1b   : > { %873 = vmatprep.mubr.msk.f32.mxu1 %vm288_vm1, %v281_v9  ;;  %900 = vmatprep.mubr.msk.f32.mxu0 %vm288_vm1, %v281_v9  ;;  %v830_v52 = vld [vmem:[%s280_s18] ss:$0 sm:$0xff]  ;;  %s977_s25 = scalar_lea.vmem %s1200_s20, 256  ;;  %s1044_s10 = smov [#allocation2]  }
  0x1c   : > { %918 = vmatpush3.bf16.msra.mxu0 %v915_v35  ;;  %p978_p11 = scmp.ne.s32.totalorder %s1200_s20, %s977_s25  ;;  %s981_s11 = sshll.u32 %s1044_s10, 4  ;;  %s982_s11 = int_to_ptr.vmem [resolvable:$false] %s981_s11 }
  0x1d   : > { %920 = vmatprep.subr.bf16.mxu0 %v919_v38  ;;  %s983_s12 = scalar_lea.vmem %s982_s11, 512  ;;  %p984_p0 = scmp.lt.s32.totalorder %s1200_s20, %s982_s11 }
  0x1e   : > { %p979_p12 = pnand %p978_p11, %p1120_p5  ;;  %p985_p1 = scmp.lt.s32.totalorder %s983_s12, %s977_s25 }
  0x20   : > { %922 = vmatpush3.bf16.msra.mxu0 %v919_v38  ;;  %p980_p13 = pneg %p979_p12  ;;  %p986_p2 = por %p985_p1, %p984_p0 }
  0x22   : > { %p987_p3 = pnand %p986_p2, %p980_p13 }
  0x23   : > { %901 = vmatmul.mubr.msk.f32.vlgmr.msra.gmra.mrb[2].mxu0 %vm288_vm1, %v282_v12 }
  0xed   : > { %v358_v10 = vpop.f32.mrb[0].mxu0 }
  0xee   : > { %v870_v11 = vpop.f32.mrb[1].mxu0  ;;  %871 = vmatprep.subr.msk.mxu1 %vm288_vm1, %v358_v10 }
  0xef   : > { %872 = vmatpush3.xpose.msk.msra.mxu1 %vm288_vm1, %v358_v10 }
  0xf0   : > { %909 = vmatprep.subr.bf16.mxu1 %v1041_v3 }
  0xf2   : > { %874 = vmatmul.mubr.msk.f32.vlgmr.msra.gmra.mrb[0].mxu1 %vm288_vm1, %v282_v12 }
  0xf3   : > { %884 = vmatprep.mubr.msk.f32.mxu1 %vm1042_vm0, %v1043_v6  ;;  %911 = vmatpush3.bf16.msra.mxu1 %v910_v16 }
  0xf4   : > { %912 = vmatprep.subr.bf16.mxu1 %v1041_v3 }
  0xf6   : > { %v902_v49 = vpop.f32.mrb[2].mxu0 }
  0xf7   : > { %914 = vmatpush3.bf16.msra.mxu1 %v913_v18  ;;  %v696_v50 = vpop.f32.mrb[3].mxu0 }
  0xfa   : > { %885 = vmatmul.mubr.msk.f32.vlgmr.msra.gmra.mrb[2].mxu1 %vm288_vm1, %v283_v8 }
 0x1c5   : > { %v875_v19 = vpop.f32.mrb[0].mxu1 }
 0x1c6   : > { %v437_v20 = vpop.f32.mrb[1].mxu1  ;;  %v450_v22 = vsel %vm446_vm2, %v875_v19, -inf }
 0x1c7   : > { %v447_v21 = vsel %vm446_vm2, %v437_v20, -inf }
 0x1c8   : > { %448 = vmax.xlane.f32.xlu0 %v447_v21 }
 0x1cc   : > { %451 = vmax.xlane.f32.xlu0 %v450_v22 }
 0x1cd   : > { %v541_v39 = vpop.f32.mrb[2].mxu1 }
 0x1ce   : > { %v886_v40 = vpop.f32.mrb[3].mxu1  ;;  %887 = vmatprep.subr.mxu1 %v541_v39 }
 0x1cf   : > { %888 = vmatpush3.msra.mxu1 %v541_v39 }
 0x255   : > { %v449_v23 = vpop.xlane.xlu0 %448 }
 0x256   : > { %v453_v24 = vsub.f32 %v437_v20, %v449_v23 }
 0x258   : > { %v455_v25 = vmul.f32 1.442695, %v453_v24 }
 0x259   : > { %v452_v26 = vpop.xlane.xlu0 %451 }
 0x25a   : > { %969 = vpow2.f32 %v455_v25  ;;  %v454_v27 = vsub.f32 %v875_v19, %v452_v26 }
 0x25c   : > { %v457_v28 = vmul.f32 1.442695, %v454_v27 }
 0x25e   : > { %971 = vpow2.f32 %v457_v28 }
 0x264   : > { %v970_v29 = vpop.eup %969 }
 0x265   : > { %v459_v30 = vsel %vm446_vm2, %v970_v29, 0.0 }
 0x266   : > { %460 = vadd.xlane.f32.xlu1 %v459_v30 }
 0x268   : > { %v972_v31 = vpop.eup %971 }
 0x269   : > { %v462_v32 = vsel %vm446_vm2, %v972_v31, 0.0 }
 0x26a   : > { %463 = vadd.xlane.f32.xlu1 %v462_v32 }
 0x2f3   : > { %v461_v41 = vpop.xlane.xlu1 %460 }
 0x2f4   : > { %v465_v42 = vadd.f32 1e-30, %v461_v41 }
 0x2f6   : > { %973 = vrcp.f32 %v465_v42 }
 0x2f7   : > { %v464_v43 = vpop.xlane.xlu1 %463 }
 0x2f8   : > { %v466_v44 = vadd.f32 1e-30, %v464_v43 }
 0x2fa   : > { %975 = vrcp.f32 %v466_v44 }
 0x300   : > { %v974_v45 = vpop.eup %973 }
 0x301   : > { %v469_v46 = vmul.f32 %v974_v45, %v970_v29 }
 0x303   : > { %889 = vmatprep.mubr.msk.f32.mxu1 %vm446_vm2, %v469_v46 }
 0x304   : > { %v976_v47 = vpop.eup %975 }
 0x305   : > { %v470_v48 = vmul.f32 %v976_v47, %v972_v31 }
 0x307   : > { %890 = vmatmul.mubr.msk.f32.vlgmr.msra.gmra.mrb[4].mxu1 %vm446_vm2, %v470_v48 }
 0x3da   : > { %v891_v51 = vpop.f32.mrb[4].mxu1 }
 0x3db   : > { %v702_v53 = vadd.f32 %v902_v49, %v891_v51  ;;  %v621_v54 = vpop.f32.mrb[5].mxu1 }
 0x3dc   : > { %v697_v55 = vadd.f32 %v696_v50, %v621_v54 }
 0x3dd   : > { %v713_v56 = vadd.f32 %v830_v52, %v702_v53 }
 0x3de   : > { %v712_v57 = vadd.f32 %v830_v52, %v697_v55 }
 0x3df   : > { %715 = vst [vmem:[%s268_s19 + $0x8] sm:$0xff] %v713_v56 }
 0x3e0   : > { %714 = vst [vmem:[%s268_s19] sm:$0xff] %v712_v57 }
 0x3e1   : > { %990 = shalt.err (!%p987_p3)
}
 0x3e2   : > { %s991_s13 = scalar_lea.hbm %s1205_s9, 256  ;;  %s995_s16 = scalar_lea.hbm %s1254_s6, 512 }
 0x3e3   : > { %p992_p4 = scmp.ne.s32.totalorder %s1205_s9, %s991_s13  ;;  %p996_p9 = scmp.lt.u32.totalorder %s1205_s9, %s1254_s6 }
 0x3e4   : > { %p997_p10 = scmp.lt.u32.totalorder %s995_s16, %s991_s13  ;;  %p999_p12 = scmp.lt.u32.totalorder %s991_s13, %s1205_s9 }
 0x3e5   : > { %p993_p7 = pnand %p992_p4, %p1120_p5 }
 0x3e6   : > { %p998_p11 = por %p997_p10, %p996_p9 }
 0x3e7   : > { %p994_p8 = pneg %p993_p7 }
 0x3e8   : > { %p1000_p13 = por %p999_p12, %p998_p11 }
 0x3ea   : > { %p1001_p0 = pnand %p1000_p13, %p994_p8 }
 0x3ec   : > { %1004 = shalt.err (!%p1001_p0)
}
 0x3ed   : > { %s1045_s26 = smov 128   ;;  %s1046_s28 = smov 8  }
 0x3ee   : > { %925 = dma.vmem_to_hbm [thread:$0]  (%p1120_p5), %s1200_s20, 256, %s1205_s9, %s1207_s17, %s1045_s26, %s1045_s26, %s1046_s28  }
 0x3ef PF: > { %p931_p1 = scmp.ge.s32.totalorder %s1039_s24, 2  ;;  %s745_s29 = sand.u32 1, %s1027_s21  }
 0x3f0   : > { %s746_s25 = scalar_lea.sflag [#allocation3], %s745_s29 }
 0x3f1   : > { %p928_p2 = pnand %p931_p1, %p1124_p6 }
 0x3f3   : > { %1022 = dma.done.wait (!%p928_p2), %s746_s25, 256  }
 0x3f4   : > { %1024 = vsyncadd (!%p928_p2), %s746_s25, 4294967040  ;;  %p16_p3 = scmp.ge.s32.totalorder %s1107_s27, 4   ;;  %s1257_s21 = smov %s1031_s22 }
 0x3f5   : > { %s1258_s22 = smov %s1035_s23  ;;  %s1259_s23 = smov %s1118_s30 }
 0x3f6   : > { %s1260_s24 = smov %s1107_s27  ;;  %18 = sbr.rel (!%p16_p3) target bundleno = 3 (0x3), region = 85 }
 0x3fd   :  { %751 = vsyncpa [#allocation3], 1 }
 0x3fe   :  { %753 = vsyncpa [#allocation3 + $0x1], 1 }

// kernel: ssl_joint_forward.2
= control target key start
LH: loop header
LB: loop body
LE: loop exit
PB: predicated region body
PF: predicated region fallthrough
CT: control target
= control target key end

     0   :  { %s1657_s15 = smov 0   ;;  %s1866_s0 = inlined_call_operand.vmem [shape: f32[64,16], index: 0, kind: input, shape index: {}]   ;;  %s1867_s1 = inlined_call_operand.vmem [shape: f32[2,16,64], index: 1, kind: input, shape index: {}]   ;;  %s1868_s2 = inlined_call_operand.vmem [shape: f32[2,16,64], index: 2, kind: input, shape index: {}]   ;;  %s1869_s3 = inlined_call_operand.vmem [shape: f32[2,1,64], index: 3, kind: input, shape index: {}]   ;;  %s1870_s4 = inlined_call_operand.vmem [shape: f32[2,8,8,16], index: 4, kind: output, shape index: {}]  }
   0x1 LB: > { %s1663_s16 = sadd.s32 4294967295, %s1623_s15   ;;  %p1360_p0 = scmp.ge.s32.totalorder %s1623_s15, 1  ;;  %s1623_s15 = sphi %s1657_s15, %s14_s15  }
   0x2   : > { %p180_p1 = scmp.lt.s32.totalorder %s1623_s15, 3 }
   0x4   : > { %p181_p2 = pnand %p1360_p0, %p180_p1 }
   0x5   : > { %p214_p3 = scmp.lt.s32.totalorder (!%p181_p2), %s1663_s16, 1  ;;  %v233_v0 = vld [vmem:[%s1866_s0] sm:$0xff] (!%p181_p2)  ;;  %vm250_vm0 = vcmask (!%p181_p2), 130048   ;;  %v1625_v1 = vmov (!%p181_p2), 0.0|0.0   ;;  %vm1626_vm1 = vmmov (!%p181_p2), 0   ;;  %v1627_v2 = vmov (!%p181_p2), 0.0  }
   0x6   : > { %184 = sbr.rel (%p181_p2) target bundleno = 5664 (0x1620), region = 36  ;;  %1442 = vmatprep.mubr.msk.f32.mxu0 (!%p181_p2), %vm250_vm0, %v233_v0  ;;  %1514 = vmatprep.subr.bf16.mxu1 (!%p181_p2), %v1625_v1  ;;  %v234_v9 = vld [vmem:[%s1866_s0 + $0x8] sm:$0xff] (!%p181_p2)  ;;  %v235_v10 = vld [vmem:[%s1866_s0 + $0x10] sm:$0xff] (!%p181_p2)  ;;  %v236_v11 = vld [vmem:[%s1866_s0 + $0x18] sm:$0xff] (!%p181_p2)  ;;  %vm380_vm2 = vcmask (!%p181_p2), 523264   ;;  %p232_p4 = scmp.eq.s32.totalorder (!%p181_p2), %s1663_s16, 1 }
   0x7   : > { %1458 = vmatprep.mubr.msk.f32.mxu1 (!%p181_p2), %vm1626_vm1, %v1627_v2  ;;  %v237_v12 = vld [vmem:[%s1866_s0 + $0x20] sm:$0xff] (!%p181_p2)  ;;  %v238_v13 = vld [vmem:[%s1866_s0 + $0x28] sm:$0xff] (!%p181_p2)  ;;  %v239_v14 = vld [vmem:[%s1866_s0 + $0x30] sm:$0xff] (!%p181_p2)  ;;  %s1628_s24 = smov (!%p181_p2), 96   ;;  %s1629_s25 = smov (!%p181_p2), 16  }
   0x8   : > { %v240_v15 = vld [vmem:[%s1866_s0 + $0x38] sm:$0xff] (!%p181_p2)  ;;  %s1631_s27 = smov (!%p181_p2), 80  }
   0xd   : > { %s1674_s19 = scalar_select %p214_p3, %s1663_s16, 1 }
   0xe   : > { %s1740_s21 = scalar_select %p232_p4, 7, 0 }
   0xf   : > { %s1401_s20 = sshll.u32 %s1674_s19, 4  ;;  %s1403_s28 = sshll.u32 %s1674_s19, 6 }
  0x10   : > { %s218_s23 = scalar_lea.vmem %s1867_s1, %s1401_s20  ;;  %s223_s26 = scalar_lea.vmem %s1868_s2, %s1401_s20 }
  0x11   : > { %v241_v3 = vld [vmem:[%s218_s23] sm:$0xff]  ;;  %v242_v4 = vld [vmem:[%s218_s23 + $0x8] sm:$0xff]  ;;  %s226_s20 = scalar_lea.vmem %s1869_s3, %s1674_s19  ;;  %s1376_s22 = sshll.u32 %s1740_s21, 3 }
  0x12   : > { %v389_v5 = vld [vmem:[%s223_s26] sm:$0xff]  ;;  %v1510_v6 = vpack.c.bf16 %v242_v4, %v241_v3  ;;  %v390_v7 = vld [vmem:[%s223_s26 + $0x8] sm:$0xff]  ;;  %s393_s23 = scalar_lea.vmem [#allocation2], %s1376_s22  ;;  %s1630_s26 = smov 32  }
  0x13   : > { %v1685_v8 = vpack.c.bf16 %v390_v7, %v389_v5  ;;  %v1367_v16 = vld [vmem:[%s226_s20] ss:$0 sm:$0xff]  ;;  %s1755_s5 = scalar_lea.vmem %s1870_s4, %s1403_s28 }
  0x14   : > { %1511 = vmatprep.subr.bf16.mxu0 %v1510_v6  ;;  %s497_s6 = scalar_lea.vmem %s1755_s5, %s1376_s22 }
  0x15   : > { %1513 = vmatpush3.bf16.msra.mxu0 %v1510_v6  ;;  %1516 = vmatpush3.bf16.msra.mxu1 %v1685_v8  ;;  %s1768_s19 = scalar_select %p232_p4, 6, 1 }
  0x16   : > { %1517 = vmatprep.subr.bf16.mxu1 %v1625_v1  ;;  %1526 = vmatprep.subr.bf16.mxu0 %v1625_v1  ;;  %s1784_s10 = scalar_select %p232_p4, 5, 2 }
  0x17   : > { %s1378_s7 = sshll.u32 %s1768_s19, 3 }
  0x18   : > { %1443 = vmatmul.mubr.msk.f32.vlgmr.msra.gmra.mrb[0].mxu0 %vm250_vm0, %v234_v9  ;;  %1459 = vmatmul.mubr.f32.vlgmr.msra.gmra.mrb[0].mxu1 %v1627_v2  ;;  %s501_s8 = scalar_lea.vmem [#allocation2], %s1378_s7  ;;  %s604_s9 = scalar_lea.vmem %s1755_s5, %s1378_s7 }
  0x19   : > { %1445 = vmatprep.mubr.msk.f32.mxu0 %vm250_vm0, %v235_v10  ;;  %1519 = vmatpush3.bf16.msra.mxu1 %v1685_v8  ;;  %s1381_s11 = sshll.u32 %s1784_s10, 3 }
  0x1a   : > { %1465 = vmatprep.mubr.msk.f32.mxu1 %vm1626_vm1, %v1627_v2  ;;  %1520 = vmatprep.subr.bf16.mxu1 %v1625_v1  ;;  %s608_s12 = scalar_lea.vmem [#allocation2], %s1381_s11  ;;  %s711_s13 = scalar_lea.vmem %s1755_s5, %s1381_s11 }
  0x1b   : > { %1528 = vmatpush3.bf16.msra.mxu0 %v1685_v8  ;;  %s1800_s14 = scalar_select %p232_p4, 4, 3 }
  0x1c   : > { %1446 = vmatmul.mubr.msk.f32.gmra.mrb[2].mxu0 %vm250_vm0, %v236_v11  ;;  %1532 = vmatprep.subr.bf16.mxu0 %v1625_v1  ;;  %s1815_s21 = scalar_select %p232_p4, 3, 4 }
  0x1d   : > { %1448 = vmatprep.mubr.msk.f32.mxu0 %vm250_vm0, %v237_v12  ;;  %s1384_s17 = sshll.u32 %s1800_s14, 3 }
  0x1e   : > { %s715_s18 = scalar_lea.vmem [#allocation2], %s1384_s17  ;;  %s818_s20 = scalar_lea.vmem %s1755_s5, %s1384_s17 }
  0x1f   : > { %s1387_s22 = sshll.u32 %s1815_s21, 3 }
  0x20   : > { %1449 = vmatmul.mubr.msk.f32.gmra.mrb[4].mxu0 %vm250_vm0, %v238_v13  ;;  %s925_s28 = scalar_lea.vmem %s1755_s5, %s1387_s22 }
  0x21   : > { %1451 = vmatprep.mubr.msk.f32.mxu0 %vm250_vm0, %v239_v14  ;;  %s1830_s29 = scalar_select %p232_p4, 2, 5 }
  0x22   : > { %s1842_s7 = scalar_select %p232_p4, 1, 6 }
  0x23   : > { %s1390_s30 = sshll.u32 %s1830_s29, 3 }
  0x24   : > { %1452 = vmatmul.mubr.msk.f32.gmra.mrb[6].mxu0 %vm250_vm0, %v240_v15  ;;  %s1032_s19 = scalar_lea.vmem %s1755_s5, %s1390_s30 }
  0x25   : > { %1486 = vmatprep.mubr.msk.f32.mxu0 %vm1626_vm1, %v1627_v2  ;;  %s1854_s11 = scalar_select %p232_p4, 0, 7 }
  0xeb   : > { %v1444_v17 = vpop.f32.mrb[0].mxu0  ;;  %v464_v18 = vpop.f32.mrb[0].mxu1 }
  0xec   : > { %v347_v19 = vadd.f32 %v1444_v17, %v1367_v16  ;;  %v341_v20 = vpop.f32.mrb[1].mxu0  ;;  %v1460_v21 = vpop.f32.mrb[1].mxu1 }
  0xed   : > { %v342_v22 = vadd.f32 %v1367_v16, %v341_v20 }
  0xee   : > { %382 = vst.msk [vmem:[#allocation2 + $0x8] sm:$0xff] %vm380_vm2, %v347_v19 }
  0xef   : > { %381 = vst.msk [vmem:[#allocation2] sm:$0xff] %vm380_vm2, %v342_v22  ;;  %v1447_v23 = vpop.f32.mrb[2].mxu0 }
  0xf0   : > { %v357_v24 = vadd.f32 %v1447_v23, %v1367_v16  ;;  %v351_v25 = vpop.f32.mrb[3].mxu0 }
  0xf1   : > { %v352_v26 = vadd.f32 %v1367_v16, %v351_v25 }
  0xf2   : > { %384 = vst.msk [vmem:[#allocation2 + $0x18] sm:$0xff] %vm380_vm2, %v357_v24 }
  0xf3   : > { %383 = vst.msk [vmem:[#allocation2 + $0x10] sm:$0xff] %vm380_vm2, %v352_v26  ;;  %v1450_v27 = vpop.f32.mrb[4].mxu0 }
  0xf4   : > { %v367_v28 = vadd.f32 %v1450_v27, %v1367_v16  ;;  %v361_v29 = vpop.f32.mrb[5].mxu0 }
  0xf5   : > { %v362_v30 = vadd.f32 %v1367_v16, %v361_v29 }
  0xf6   : > { %386 = vst.msk [vmem:[#allocation2 + $0x28] sm:$0xff] %vm380_vm2, %v367_v28 }
  0xf7   : > { %385 = vst.msk [vmem:[#allocation2 + $0x20] sm:$0xff] %vm380_vm2, %v362_v30  ;;  %v1453_v31 = vpop.f32.mrb[6].mxu0 }
  0xf8   : > { %v377_v32 = vadd.f32 %v1453_v31, %v1367_v16  ;;  %v371_v33 = vpop.f32.mrb[7].mxu0 }
  0xf9   : > { %v372_v34 = vadd.f32 %v1367_v16, %v371_v33 }
  0xfa   : > { %388 = vst.msk [vmem:[#allocation2 + $0x38] sm:$0xff] %vm380_vm2, %v377_v32 }
  0xfb   : > { %387 = vst.msk [vmem:[#allocation2 + $0x30] sm:$0xff] %vm380_vm2, %v372_v34 }
 0x102   : > { %v394_v35 = vld [vmem:[%s393_s23] sm:$0xff]  ;;  %s822_s23 = scalar_lea.vmem [#allocation2], %s1387_s22 }
 0x103   : > { %v468_v36 = vadd.f32 %v464_v18, %v394_v35  ;;  %v502_v51 = vld [vmem:[%s501_s8] sm:$0xff]  ;;  %s1393_s8 = sshll.u32 %s1842_s7, 3 }
 0x104   : > { %v609_v7 = vld [vmem:[%s608_s12] sm:$0xff]  ;;  %s1139_s10 = scalar_lea.vmem %s1755_s5, %s1393_s8  ;;  %s1396_s12 = sshll.u32 %s1854_s11, 3 }
 0x105   : > { %1553 = vtanh.f32 %v468_v36  ;;  %v1377_v38 = vmul.f32 -1.442695, %v468_v36  ;;  %v716_v26 = vld [vmem:[%s715_s18] sm:$0xff]  ;;  %s1246_s16 = scalar_lea.vmem %s1755_s5, %s1396_s12 }
 0x107   : > { %1555 = vpow2.f32 %v1377_v38 }
 0x10f   : > { %v1554_v37 = vpop.eup %1553 }
 0x110   : > { %478 = vrot.lane.b32.xlu0 %v1554_v37, %s1628_s24 }
 0x111   : > { %v1556_v39 = vpop.eup %1555 }
 0x112   : > { %v472_v40 = vadd.f32 1.0, %v1556_v39 }
 0x114   : > { %1557 = vrcp.f32 %v472_v40 }
 0x11e   : > { %v1558_v41 = vpop.eup %1557 }
 0x11f   : > { %v476_v44 = vmul.f32 0.0, %v1558_v41 }
 0x182   : > { %v479_v42 = vpop.permute.xlu0 %478 }
 0x183   : > { %v481_v43 = vmul.f32 %v1558_v41, %v479_v42 }
 0x185   : > { %483 = vrot.lane.b32.xlu0 %v481_v43, %s1629_s25  ;;  %v823_v43 = vld [vmem:[%s822_s23] sm:$0xff] }
 0x1f7   : > { %v484_v45 = vpop.permute.xlu0 %483 }
 0x1f8   : > { %v486_v46 = vadd.f32 %v484_v45, %v476_v44 }
 0x1fa   : > { %1559 = vtanh.f32 %v486_v46 }
 0x204   : > { %v1560_v47 = vpop.eup %1559 }
 0x205   : > { %489 = vrot.lane.b32.xlu1 %v1560_v47, %s1630_s26 }
 0x277   : > { %v490_v48 = vpop.permute.xlu1 %489 }
 0x278   : > { %v492_v49 = vmul.f32 %v1558_v41, %v490_v48 }
 0x27a   : > { %494 = vrot.lane.b32.xlu1 %v492_v49, %s1631_s27 }
 0x2ec   : > { %v495_v50 = vpop.permute.xlu1 %494 }
 0x2ed   : > { %498 = vst.msk [vmem:[%s497_s6] sm:$0xff] %vm250_vm0, %v495_v50  ;;  %1466 = vmatmul.mubr.msk.f32.vlgmr.msra.gmra.mrb[2].mxu1 %vm250_vm0, %v495_v50  ;;  %s929_s6 = scalar_lea.vmem [#allocation2], %s1390_s30 }
 0x2ee   : > { %1522 = vmatpush3.bf16.msra.mxu1 %v1685_v8  ;;  %1472 = vmatprep.mubr.msk.f32.mxu1 %vm1626_vm1, %v1627_v2 }
 0x2ef   : > { %1523 = vmatprep.subr.bf16.mxu1 %v1625_v1 }
 0x3c0   : > { %v571_v52 = vpop.f32.mrb[2].mxu1 }
 0x3c1   : > { %v575_v53 = vadd.f32 %v571_v52, %v502_v51  ;;  %v1467_v54 = vpop.f32.mrb[3].mxu1 }
 0x3c3   : > { %1561 = vtanh.f32 %v575_v53  ;;  %v1380_v56 = vmul.f32 -1.442695, %v575_v53 }
 0x3c5   : > { %1563 = vpow2.f32 %v1380_v56 }
 0x3cd   : > { %v1562_v55 = vpop.eup %1561 }
 0x3ce   : > { %585 = vrot.lane.b32.xlu0 %v1562_v55, %s1628_s24 }
 0x3cf   : > { %v1564_v57 = vpop.eup %1563 }
 0x3d0   : > { %v579_v58 = vadd.f32 1.0, %v1564_v57 }
 0x3d2   : > { %1565 = vrcp.f32 %v579_v58 }
 0x3dc   : > { %v1566_v59 = vpop.eup %1565 }
 0x3dd   : > { %v583_v62 = vmul.f32 %v1566_v59, %v486_v46 }
 0x440   : > { %v586_v60 = vpop.permute.xlu0 %585 }
 0x441   : > { %v588_v61 = vmul.f32 %v1566_v59, %v586_v60 }
 0x443   : > { %590 = vrot.lane.b32.xlu1 %v588_v61, %s1629_s25  ;;  %v930_v61 = vld [vmem:[%s929_s6] sm:$0xff] }
 0x4b5   : > { %v591_v63 = vpop.permute.xlu1 %590 }
 0x4b6   : > { %v593_v0 = vadd.f32 %v591_v63, %v583_v62 }
 0x4b8   : > { %1567 = vtanh.f32 %v593_v0 }
 0x4c2   : > { %v1568_v3 = vpop.eup %1567 }
 0x4c3   : > { %596 = vrot.lane.b32.xlu0 %v1568_v3, %s1630_s26 }
 0x535   : > { %v597_v4 = vpop.permute.xlu0 %596 }
 0x536   : > { %v599_v5 = vmul.f32 %v1566_v59, %v597_v4 }
 0x538   : > { %601 = vrot.lane.b32.xlu1 %v599_v5, %s1631_s27 }
 0x5aa   : > { %v602_v6 = vpop.permute.xlu1 %601 }
 0x5ab   : > { %605 = vst.msk [vmem:[%s604_s9] sm:$0xff] %vm250_vm0, %v602_v6  ;;  %1473 = vmatmul.mubr.msk.f32.vlgmr.msra.gmra.mrb[4].mxu1 %vm250_vm0, %v602_v6  ;;  %s1036_s9 = scalar_lea.vmem [#allocation2], %s1393_s8 }
 0x5ac   : > { %1525 = vmatpush3.bf16.msra.mxu1 %v1685_v8  ;;  %1479 = vmatprep.mubr.msk.f32.mxu1 %vm1626_vm1, %v1627_v2 }
 0x5ad   : > { %1529 = vmatprep.subr.bf16.mxu1 %v1625_v1 }
 0x67e   : > { %v678_v9 = vpop.f32.mrb[4].mxu1 }
 0x67f   : > { %v682_v10 = vadd.f32 %v678_v9, %v609_v7  ;;  %v1474_v11 = vpop.f32.mrb[5].mxu1 }
 0x681   : > { %1569 = vtanh.f32 %v682_v10  ;;  %v1383_v13 = vmul.f32 -1.442695, %v682_v10 }
 0x683   : > { %1571 = vpow2.f32 %v1383_v13 }
 0x68b   : > { %v1570_v12 = vpop.eup %1569 }
 0x68c   : > { %692 = vrot.lane.b32.xlu0 %v1570_v12, %s1628_s24 }
 0x68d   : > { %v1572_v14 = vpop.eup %1571 }
 0x68e   : > { %v686_v15 = vadd.f32 1.0, %v1572_v14 }
 0x690   : > { %1573 = vrcp.f32 %v686_v15 }
 0x69a   : > { %v1574_v16 = vpop.eup %1573 }
 0x69b   : > { %v690_v19 = vmul.f32 %v1574_v16, %v593_v0 }
 0x6fe   : > { %v693_v17 = vpop.permute.xlu0 %692 }
 0x6ff   : > { %v695_v18 = vmul.f32 %v1574_v16, %v693_v17 }
 0x701   : > { %697 = vrot.lane.b32.xlu1 %v695_v18, %s1629_s25 }
 0x773   : > { %v698_v20 = vpop.permute.xlu1 %697 }
 0x774   : > { %v700_v21 = vadd.f32 %v698_v20, %v690_v19 }
 0x776   : > { %1575 = vtanh.f32 %v700_v21 }
 0x780   : > { %v1576_v22 = vpop.eup %1575 }
 0x781   : > { %703 = vrot.lane.b32.xlu0 %v1576_v22, %s1630_s26 }
 0x7f3   : > { %v704_v23 = vpop.permute.xlu0 %703 }
 0x7f4   : > { %v706_v24 = vmul.f32 %v1574_v16, %v704_v23  ;;  %v1037_v16 = vld [vmem:[%s1036_s9] sm:$0xff] }
 0x7f6   : > { %708 = vrot.lane.b32.xlu1 %v706_v24, %s1631_s27 }
 0x868   : > { %v709_v25 = vpop.permute.xlu1 %708 }
 0x869   : > { %712 = vst.msk [vmem:[%s711_s13] sm:$0xff] %vm250_vm0, %v709_v25  ;;  %1480 = vmatmul.mubr.msk.f32.vlgmr.msra.gmra.mrb[6].mxu1 %vm250_vm0, %v709_v25  ;;  %s1143_s13 = scalar_lea.vmem [#allocation2], %s1396_s12 }
 0x86a   : > { %1531 = vmatpush3.bf16.msra.mxu1 %v1685_v8  ;;  %1493 = vmatprep.mubr.msk.f32.mxu1 %vm1626_vm1, %v1627_v2 }
 0x86b   : > { %1535 = vmatprep.subr.bf16.mxu1 %v1625_v1 }
 0x93c   : > { %v785_v27 = vpop.f32.mrb[6].mxu1 }
 0x93d   : > { %v789_v28 = vadd.f32 %v785_v27, %v716_v26  ;;  %v1481_v29 = vpop.f32.mrb[7].mxu1 }
 0x93f   : > { %1577 = vtanh.f32 %v789_v28  ;;  %v1386_v31 = vmul.f32 -1.442695, %v789_v28 }
 0x941   : > { %1579 = vpow2.f32 %v1386_v31 }
 0x949   : > { %v1578_v30 = vpop.eup %1577 }
 0x94a   : > { %799 = vrot.lane.b32.xlu0 %v1578_v30, %s1628_s24 }
 0x94b   : > { %v1580_v32 = vpop.eup %1579 }
 0x94c   : > { %v793_v33 = vadd.f32 1.0, %v1580_v32 }
 0x94e   : > { %1581 = vrcp.f32 %v793_v33 }
 0x958   : > { %v1582_v1 = vpop.eup %1581 }
 0x959   : > { %v797_v36 = vmul.f32 %v1582_v1, %v700_v21 }
 0x9bc   : > { %v800_v34 = vpop.permute.xlu0 %799 }
 0x9bd   : > { %v802_v35 = vmul.f32 %v1582_v1, %v800_v34 }
 0x9bf   : > { %804 = vrot.lane.b32.xlu1 %v802_v35, %s1629_s25 }
 0xa31   : > { %v805_v37 = vpop.permute.xlu1 %804 }
 0xa32   : > { %v807_v38 = vadd.f32 %v805_v37, %v797_v36 }
 0xa34   : > { %1583 = vtanh.f32 %v807_v38 }
 0xa3e   : > { %v1584_v39 = vpop.eup %1583 }
 0xa3f   : > { %810 = vrot.lane.b32.xlu0 %v1584_v39, %s1630_s26 }
 0xab1   : > { %v811_v40 = vpop.permute.xlu0 %810 }
 0xab2   : > { %v813_v41 = vmul.f32 %v1582_v1, %v811_v40  ;;  %v1144_v1 = vld [vmem:[%s1143_s13] sm:$0xff] }
 0xab4   : > { %815 = vrot.lane.b32.xlu1 %v813_v41, %s1631_s27 }
 0xb26   : > { %v816_v42 = vpop.permute.xlu1 %815 }
 0xb27   : > { %819 = vst.msk [vmem:[%s818_s20] sm:$0xff] %vm250_vm0, %v816_v42  ;;  %1487 = vmatmul.mubr.msk.f32.vlgmr.msra.gmra.mrb[8].mxu0 %vm250_vm0, %v816_v42 }
 0xb28   : > { %1534 = vmatpush3.bf16.msra.mxu0 %v1685_v8  ;;  %1500 = vmatprep.mubr.msk.f32.mxu0 %vm1626_vm1, %v1627_v2 }
 0xbfa   : > { %v892_v44 = vpop.f32.mrb[8].mxu0 }
 0xbfb   : > { %v896_v45 = vadd.f32 %v892_v44, %v823_v43  ;;  %v1488_v46 = vpop.f32.mrb[9].mxu0 }
 0xbfd   : > { %1585 = vtanh.f32 %v896_v45  ;;  %v1389_v48 = vmul.f32 -1.442695, %v896_v45 }
 0xbff   : > { %1587 = vpow2.f32 %v1389_v48 }
 0xc07   : > { %v1586_v47 = vpop.eup %1585 }
 0xc08   : > { %906 = vrot.lane.b32.xlu0 %v1586_v47, %s1628_s24 }
 0xc09   : > { %v1588_v49 = vpop.eup %1587 }
 0xc0a   : > { %v900_v50 = vadd.f32 1.0, %v1588_v49 }
 0xc0c   : > { %1589 = vrcp.f32 %v900_v50 }
 0xc16   : > { %v1590_v51 = vpop.eup %1589 }
 0xc17   : > { %v904_v54 = vmul.f32 %v1590_v51, %v807_v38 }
 0xc7a   : > { %v907_v52 = vpop.permute.xlu0 %906 }
 0xc7b   : > { %v909_v53 = vmul.f32 %v1590_v51, %v907_v52 }
 0xc7d   : > { %911 = vrot.lane.b32.xlu1 %v909_v53, %s1629_s25 }
 0xcef   : > { %v912_v55 = vpop.permute.xlu1 %911 }
 0xcf0   : > { %v914_v56 = vadd.f32 %v912_v55, %v904_v54 }
 0xcf2   : > { %1591 = vtanh.f32 %v914_v56 }
 0xcfc   : > { %v1592_v57 = vpop.eup %1591 }
 0xcfd   : > { %917 = vrot.lane.b32.xlu0 %v1592_v57, %s1630_s26 }
 0xd6f   : > { %v918_v58 = vpop.permute.xlu0 %917 }
 0xd70   : > { %v920_v59 = vmul.f32 %v1590_v51, %v918_v58 }
 0xd72   : > { %922 = vrot.lane.b32.xlu1 %v920_v59, %s1631_s27 }
 0xde4   : > { %v923_v60 = vpop.permute.xlu1 %922 }
 0xde5   : > { %926 = vst.msk [vmem:[%s925_s28] sm:$0xff] %vm250_vm0, %v923_v60  ;;  %1494 = vmatmul.mubr.msk.f32.vlgmr.msra.gmra.mrb[8].mxu1 %vm250_vm0, %v923_v60 }
 0xde6   : > { %1537 = vmatpush3.bf16.msra.mxu1 %v1685_v8  ;;  %1507 = vmatprep.mubr.msk.f32.mxu1 %vm1626_vm1, %v1627_v2 }
 0xeb8   : > { %v999_v62 = vpop.f32.mrb[8].mxu1 }
 0xeb9   : > { %v1003_v63 = vadd.f32 %v999_v62, %v930_v61  ;;  %v1495_v0 = vpop.f32.mrb[9].mxu1 }
 0xebb   : > { %1593 = vtanh.f32 %v1003_v63  ;;  %v1392_v4 = vmul.f32 -1.442695, %v1003_v63 }
 0xebd   : > { %1595 = vpow2.f32 %v1392_v4 }
 0xec5   : > { %v1594_v3 = vpop.eup %1593 }
 0xec6   : > { %1013 = vrot.lane.b32.xlu0 %v1594_v3, %s1628_s24 }
 0xec7   : > { %v1596_v8 = vpop.eup %1595 }
 0xec8   : > { %v1007_v5 = vadd.f32 1.0, %v1596_v8 }
 0xeca   : > { %1597 = vrcp.f32 %v1007_v5 }
 0xed4   : > { %v1598_v2 = vpop.eup %1597 }
 0xed5   : > { %v1011_v9 = vmul.f32 %v1598_v2, %v914_v56 }
 0xf38   : > { %v1014_v6 = vpop.permute.xlu0 %1013 }
 0xf39   : > { %v1016_v7 = vmul.f32 %v1598_v2, %v1014_v6 }
 0xf3b   : > { %1018 = vrot.lane.b32.xlu1 %v1016_v7, %s1629_s25 }
 0xfad   : > { %v1019_v10 = vpop.permute.xlu1 %1018 }
 0xfae   : > { %v1021_v11 = vadd.f32 %v1019_v10, %v1011_v9 }
 0xfb0   : > { %1599 = vtanh.f32 %v1021_v11 }
 0xfba   : > { %v1600_v12 = vpop.eup %1599 }
 0xfbb   : > { %1024 = vrot.lane.b32.xlu0 %v1600_v12, %s1630_s26 }
0x102d   : > { %v1025_v13 = vpop.permute.xlu0 %1024 }
0x102e   : > { %v1027_v14 = vmul.f32 %v1598_v2, %v1025_v13 }
0x1030   : > { %1029 = vrot.lane.b32.xlu1 %v1027_v14, %s1631_s27 }
0x10a2   : > { %v1030_v15 = vpop.permute.xlu1 %1029 }
0x10a3   : > { %1033 = vst.msk [vmem:[%s1032_s19] sm:$0xff] %vm250_vm0, %v1030_v15  ;;  %1501 = vmatmul.mubr.msk.f32.vlgmr.msra.gmra.mrb[10].mxu0 %vm250_vm0, %v1030_v15 }
0x1176   : > { %v1106_v17 = vpop.f32.mrb[10].mxu0 }
0x1177   : > { %v1110_v18 = vadd.f32 %v1106_v17, %v1037_v16  ;;  %v1502_v19 = vpop.f32.mrb[11].mxu0 }
0x1179   : > { %1601 = vtanh.f32 %v1110_v18  ;;  %v1395_v21 = vmul.f32 -1.442695, %v1110_v18 }
0x117b   : > { %1603 = vpow2.f32 %v1395_v21 }
0x1183   : > { %v1602_v20 = vpop.eup %1601 }
0x1184   : > { %1120 = vrot.lane.b32.xlu0 %v1602_v20, %s1628_s24 }
0x1185   : > { %v1604_v22 = vpop.eup %1603 }
0x1186   : > { %v1114_v23 = vadd.f32 1.0, %v1604_v22 }
0x1188   : > { %1605 = vrcp.f32 %v1114_v23 }
0x1192   : > { %v1606_v24 = vpop.eup %1605 }
0x1193   : > { %v1118_v27 = vmul.f32 %v1606_v24, %v1021_v11 }
0x11f6   : > { %v1121_v25 = vpop.permute.xlu0 %1120 }
0x11f7   : > { %v1123_v26 = vmul.f32 %v1606_v24, %v1121_v25 }
0x11f9   : > { %1125 = vrot.lane.b32.xlu1 %v1123_v26, %s1629_s25 }
0x126b   : > { %v1126_v28 = vpop.permute.xlu1 %1125 }
0x126c   : > { %v1128_v29 = vadd.f32 %v1126_v28, %v1118_v27 }
0x126e   : > { %1607 = vtanh.f32 %v1128_v29 }
0x1278   : > { %v1608_v30 = vpop.eup %1607 }
0x1279   : > { %1131 = vrot.lane.b32.xlu0 %v1608_v30, %s1630_s26 }
0x12eb   : > { %v1132_v31 = vpop.permute.xlu0 %1131 }
0x12ec   : > { %v1134_v32 = vmul.f32 %v1606_v24, %v1132_v31 }
0x12ee   : > { %1136 = vrot.lane.b32.xlu1 %v1134_v32, %s1631_s27 }
0x1360   : > { %v1137_v33 = vpop.permute.xlu1 %1136 }
0x1361   : > { %1140 = vst.msk [vmem:[%s1139_s10] sm:$0xff] %vm250_vm0, %v1137_v33  ;;  %1508 = vmatmul.mubr.msk.f32.vlgmr.msra.gmra.mrb[10].mxu1 %vm250_vm0, %v1137_v33 }
0x1434   : > { %v1213_v34 = vpop.f32.mrb[10].mxu1 }
0x1435   : > { %v1217_v35 = vadd.f32 %v1213_v34, %v1144_v1  ;;  %v1509_v36 = vpop.f32.mrb[11].mxu1 }
0x1437   : > { %1609 = vtanh.f32 %v1217_v35  ;;  %v1398_v38 = vmul.f32 -1.442695, %v1217_v35 }
0x1439   : > { %1611 = vpow2.f32 %v1398_v38 }
0x1441   : > { %v1610_v37 = vpop.eup %1609 }
0x1442   : > { %1227 = vrot.lane.b32.xlu0 %v1610_v37, %s1628_s24 }
0x1443   : > { %v1612_v39 = vpop.eup %1611 }
0x1444   : > { %v1221_v40 = vadd.f32 1.0, %v1612_v39 }
0x1446   : > { %1613 = vrcp.f32 %v1221_v40 }
0x1450   : > { %v1614_v41 = vpop.eup %1613 }
0x1451   : > { %v1225_v44 = vmul.f32 %v1614_v41, %v1128_v29 }
0x14b4   : > { %v1228_v42 = vpop.permute.xlu0 %1227 }
0x14b5   : > { %v1230_v43 = vmul.f32 %v1614_v41, %v1228_v42 }
0x14b7   : > { %1232 = vrot.lane.b32.xlu1 %v1230_v43, %s1629_s25 }
0x1529   : > { %v1233_v45 = vpop.permute.xlu1 %1232 }
0x152a   : > { %v1235_v46 = vadd.f32 %v1233_v45, %v1225_v44 }
0x152c   : > { %1615 = vtanh.f32 %v1235_v46 }
0x1536   : > { %v1616_v47 = vpop.eup %1615 }
0x1537   : > { %1238 = vrot.lane.b32.xlu0 %v1616_v47, %s1630_s26 }
0x15a9   : > { %v1239_v48 = vpop.permute.xlu0 %1238 }
0x15aa   : > { %v1241_v49 = vmul.f32 %v1614_v41, %v1239_v48 }
0x15ac   : > { %1243 = vrot.lane.b32.xlu1 %v1241_v49, %s1631_s27 }
0x161e   : > { %v1244_v50 = vpop.permute.xlu1 %1243 }
0x161f   : > { %1247 = vst.msk [vmem:[%s1246_s16] sm:$0xff] %vm250_vm0, %v1244_v50 }
0x1620 PF: > { %s14_s15 = sadd.s32 1, %s1623_s15  }
0x1621   : > { %p11_p5 = scmp.ge.s32.totalorder %s14_s15, 4  }
0x1623   :  { %13 = sbr.rel (!%p11_p5) target bundleno = 1 (0x1), region = 88 }

</bundles_post_ra>
